<compile_context>
chip_gen: v7x
topology: tpu7x:2x2x1
jax: 0.10.0
libtpu: 0.0.40
codegen_flags: <defaults>
</compile_context>

<pallas_src>
from functools import partial

import jax
import jax.numpy as jnp
from jax import lax
from jax.experimental import pallas as pl
from jax.experimental.pallas import tpu as pltpu


def audio_lstm_kernel(x_ref, len_ref, maxlen_ref,
                      wih_ref, whh_ref, b_ref,
                      w1_ref, b1_ref, w2_ref, b2_ref, w3_ref, b3_ref,
                      out_ref,
                      gx_scr, h_scr, c_scr, m_scr, l_scr, acc_scr,
                      *, bf16_act):
    Tc, Bb, Din = x_ref.shape              # time-chunk length, batch block, input dim
    H = whh_ref.shape[0]

    tj = pl.program_id(1)                  # time-chunk index ("arbitrary" axis)
    n_tj = pl.num_programs(1)
    t0 = tj * Tc                           # absolute start time of this chunk

    neg = jnp.float32(-1e30)               # finite "masked" score (graceful if all-masked)

    # ---- init carried state at the first time chunk of each batch block ----
    @pl.when(tj == 0)
    def _():
        h_scr[...] = jnp.zeros_like(h_scr)
        c_scr[...] = jnp.zeros_like(c_scr)
        m_scr[...] = jnp.full_like(m_scr, neg)
        l_scr[...] = jnp.zeros_like(l_scr)
        acc_scr[...] = jnp.zeros_like(acc_scr)

    # ---- hoisted input projection for this chunk: ONE 2-D bf16 MXU matmul ----
    # (Tc*Bb, Din) @ (Din, 4H) -> f32, bias added once, viewed as (Tc, Bb, 4H).
    x2d = x_ref[...].reshape(Tc * Bb, Din)                      # bf16
    gx = jnp.dot(x2d, wih_ref[...],
                 preferred_element_type=jnp.float32) + b_ref[...]
    gx_scr[...] = gx.reshape(Tc, Bb, 4 * H)
    # TODO(synk): gx_scr could be stored bf16 to halve the chunk scratch; kept
    # f32 here since the chunk is already bounded by block_t.

    lens = len_ref[...]                    # (Bb, 1) int32 valid lengths
    max_len = maxlen_ref[0]                # int32 scalar = max(audio_len)

    # Hoist weight / bias loads out of the serial recurrence.
    whh = whh_ref[...]                     # (H, 4H) bf16
    w1 = w1_ref[...]; b1 = b1_ref[...]     # bf16 / f32
    w2 = w2_ref[...]; b2 = b2_ref[...]     # bf16 / f32
    w3 = w3_ref[...]; b3 = b3_ref[...]     # f32 row / f32

    def step(k, carry):
        h, c, m, l, acc = carry
        t = t0 + k                                                  # absolute time

        # Recurrent projection only; input projection already in gx_scr.
        gates = gx_scr[k] + jnp.dot(h.astype(jnp.bfloat16), whh,
                                    preferred_element_type=jnp.float32)   # (Bb, 4H) f32

        # Gate activations: bf16 EUP path on v6e/v7x, f32 on v5e.
        ga = gates.astype(jnp.bfloat16) if bf16_act else gates
        i_g = jax.nn.sigmoid(ga[:, 0:H]).astype(jnp.float32)
        f_g = jax.nn.sigmoid(ga[:, H:2 * H]).astype(jnp.float32)
        g_g = jnp.tanh(ga[:, 2 * H:3 * H]).astype(jnp.float32)
        o_g = jax.nn.sigmoid(ga[:, 3 * H:4 * H]).astype(jnp.float32)
        c = f_g * c + i_g * g_g
        h = o_g * jnp.tanh(c)

        # pack/pad_packed emulation: rows past their own length emit zeros.
        out_t = jnp.where(t < lens, h, 0.0)                          # (Bb, H) f32

        # AttentionNet MLP for this timestep (Dropout = identity, eval mode).
        a1 = jnp.maximum(
            jnp.dot(out_t.astype(jnp.bfloat16), w1,
                    preferred_element_type=jnp.float32) + b1, 0.0)
        a2 = jnp.maximum(
            jnp.dot(a1.astype(jnp.bfloat16), w2,
                    preferred_element_type=jnp.float32) + b2, 0.0)
        # Final score via VPU reduction instead of an N=1 MXU matmul.
        score = jnp.sum(a2 * w3, axis=-1, keepdims=True) + b3        # (Bb, 1)
        # Softmax only runs over t < max(audio_len) (pad_packed truncation).
        score = jnp.where(t < max_len, score, neg)

        # Online (flash-style) softmax over time; exp kept in f32 for the
        # accumulator path.
        m_new = jnp.maximum(m, score)
        alpha = jnp.exp(m - m_new)
        p = jnp.exp(score - m_new)
        l = alpha * l + p
        acc = alpha * acc + p * out_t
        return h, c, m_new, l, acc

    init = (h_scr[...], c_scr[...], m_scr[...], l_scr[...], acc_scr[...])
    # Unroll 2 at production chunk sizes (avoid vreg spills); full for tiny chunks.
    unroll = Tc if Tc <= 8 else 2
    h, c, m, l, acc = lax.fori_loop(0, Tc, step, init, unroll=unroll)

    # Carry state to the next time chunk.
    h_scr[...] = h
    c_scr[...] = c
    m_scr[...] = m
    l_scr[...] = l
    acc_scr[...] = acc

    @pl.when(tj == n_tj - 1)
    def _():
        out_ref[...] = (acc * pl.reciprocal(l, approx=True)).astype(out_ref.dtype)


def _vmem_limit_bytes(block_t, block_b, Din, H, vmem_cap_bytes):
    f32, bf16, i32 = 4, 2, 4
    h2, h4 = max(H // 2, 1), max(H // 4, 1)
    # Pipelined (double-buffered) blocks: x chunk, lens block, out block.
    pipelined = 2 * (block_t * block_b * Din * bf16
                     + block_b * i32
                     + block_b * H * f32)
    # Weights are single-resident (memory_space=VMEM, no revolving buffers).
    weights = (Din * 4 * H * bf16 + H * 4 * H * bf16 + 4 * H * f32
               + H * h2 * bf16 + h2 * f32
               + h2 * h4 * bf16 + h4 * f32
               + h4 * f32 + f32)
    # Scratch: hoisted-gates chunk + carried state.
    scratch = (block_t * block_b * 4 * H * f32
               + 3 * block_b * H * f32
               + 2 * block_b * f32)
    need = pipelined + weights + scratch + (1 << 20)       # +1 MiB headroom
    return int(min(max(need, 8 << 20), vmem_cap_bytes))


@partial(jax.jit, static_argnames=("block_b", "block_t", "bf16_act", "vmem_cap_bytes"))
def audio_lstm_forward(x, audio_len, params, *, block_b=None, block_t=None,
                       bf16_act=False, vmem_cap_bytes=56 << 20):
    """x: (B, T, Din) float32 batch-first (PyTorch layout); audio_len: (B,) int.

    block_b: batch tile. Single-TC chips (v5e/v6e): block_b = B (grid of 1 batch
      block) up to the VMEM budget. v7x: keep >= 2 blocks so both TensorCores
      are used. block_t: time-chunk length (bounds VMEM independent of T).
    vmem_cap_bytes: 56 MiB default is safe on v7x (64 MiB physical); raise
      towards ~96 MiB on v5e/v6e (128 MiB physical) for bigger tiles.
    """
    B, T, Din = x.shape
    H = params["whh_t"].shape[0]

    if block_b is None:
        block_b = B                        # single-TC default: whole batch, grid=1
    if block_t is None:
        block_t = T if T <= 128 else 128
        while T % block_t:
            block_t //= 2
    assert B % block_b == 0, "batch must be divisible by block_b"
    assert block_b % 8 == 0, "block_b should be a multiple of 8 (sublanes)"
    assert T % block_t == 0, "T must be divisible by block_t"

    # Time-major + bf16 (fuses with the f32->bf16 convert under jit).
    x_tb = jnp.transpose(x, (1, 0, 2)).astype(jnp.bfloat16)          # (T, B, Din)
    lens = audio_len.astype(jnp.int32).reshape(B, 1)                 # int32 compare in-kernel
    max_len = jnp.max(audio_len).astype(jnp.int32).reshape(1)        # pad_packed length

    weights = (params["wih_t"], params["whh_t"], params["b"],
               params["w1"], params["b1"], params["w2"], params["b2"],
               params["w3row"], params["b3"])

    # Replicated weights: whole-array resident in VMEM, no double-buffering.
    vmem_spec = pl.BlockSpec(memory_space=pltpu.MemorySpace.VMEM)
    in_specs = ([pl.BlockSpec((block_t, block_b, Din), lambda i, j: (j, i, 0)),
                 pl.BlockSpec((block_b, 1), lambda i, j: (i, 0)),
                 pl.BlockSpec(memory_space=pltpu.MemorySpace.SMEM)]
                + [vmem_spec] * len(weights))

    grid = (B // block_b, T // block_t)

    return pl.pallas_call(
        partial(audio_lstm_kernel, bf16_act=bool(bf16_act)),
        out_shape=jax.ShapeDtypeStruct((B, H), jnp.float32),
        grid=grid,
        in_specs=in_specs,
        out_specs=pl.BlockSpec((block_b, H), lambda i, j: (i, 0)),
        scratch_shapes=[pltpu.VMEM((block_t, block_b, 4 * H), jnp.float32),  # gates chunk
                        pltpu.VMEM((block_b, H), jnp.float32),               # h
                        pltpu.VMEM((block_b, H), jnp.float32),               # c
                        pltpu.VMEM((block_b, 1), jnp.float32),               # running max
                        pltpu.VMEM((block_b, 1), jnp.float32),               # softmax denom
                        pltpu.VMEM((block_b, H), jnp.float32)],              # weighted sum
        compiler_params=pltpu.CompilerParams(
            dimension_semantics=("parallel", "arbitrary"),
            vmem_limit_bytes=_vmem_limit_bytes(block_t, block_b, Din, H,
                                               vmem_cap_bytes)),
    )(x_tb, lens, max_len, *weights)


# ------------------------- deterministic parameter init -------------------------
def init_params(key, input_size, hidden_size):
    H = hidden_size
    ks = jax.random.split(key, 10)
    k_lstm = 1.0 / jnp.sqrt(H)

    def u(k, shape, bound):
        return jax.random.uniform(k, shape, jnp.float32, -bound, bound)

    w_ih = u(ks[0], (4 * H, input_size), k_lstm)   # PyTorch weight_ih_l0
    w_hh = u(ks[1], (4 * H, H), k_lstm)            # PyTorch weight_hh_l0
    b_ih = u(ks[2], (4 * H,), k_lstm)
    b_hh = u(ks[3], (4 * H,), k_lstm)

    h2, h4 = H // 2, H // 4
    w1 = u(ks[4], (h2, H), 1.0 / jnp.sqrt(H))      # Linear(H, H//2)
    b1 = u(ks[5], (h2,), 1.0 / jnp.sqrt(H))
    w2 = u(ks[6], (h4, h2), 1.0 / jnp.sqrt(h2))    # Linear(H//2, H//4)
    b2 = u(ks[7], (h4,), 1.0 / jnp.sqrt(h2))
    w3 = u(ks[8], (1, h4), 1.0 / jnp.sqrt(h4))     # Linear(H//4, 1)
    b3 = u(ks[9], (1,), 1.0 / jnp.sqrt(h4))

    return {
        "wih_t": jnp.transpose(w_ih).astype(jnp.bfloat16),   # (Din, 4H) bf16
        "whh_t": jnp.transpose(w_hh).astype(jnp.bfloat16),   # (H, 4H) bf16
        "b": (b_ih + b_hh).reshape(1, 4 * H),                # (1, 4H) f32
        "w1": jnp.transpose(w1).astype(jnp.bfloat16),        # (H, H//2) bf16
        "b1": b1.reshape(1, h2),
        "w2": jnp.transpose(w2).astype(jnp.bfloat16),        # (H//2, H//4) bf16
        "b2": b2.reshape(1, h4),
        "w3row": w3,                                         # (1, H//4) f32 row
        "b3": b3.reshape(1, 1),
    }


# ------------------------------ pure-JAX reference ------------------------------
def reference_forward(x, audio_len, p, bf16_act=False):
    """Mirrors the kernel's dtype choices (bf16 matmul operands, optional bf16
    gate activations) so the comparison isolates kernel correctness."""
    B, T, _ = x.shape
    H = p["whh_t"].shape[0]
    xr = x.astype(jnp.bfloat16)
    h = jnp.zeros((B, H), jnp.float32)
    c = jnp.zeros((B, H), jnp.float32)
    outs = []
    for t in range(T):
        gates = (jnp.dot(xr[:, t, :], p["wih_t"],
                         preferred_element_type=jnp.float32) + p["b"]
                 + jnp.dot(h.astype(jnp.bfloat16), p["whh_t"],
                           preferred_element_type=jnp.float32))
        ga = gates.astype(jnp.bfloat16) if bf16_act else gates
        i = jax.nn.sigmoid(ga[:, :H]).astype(jnp.float32)
        f = jax.nn.sigmoid(ga[:, H:2 * H]).astype(jnp.float32)
        g = jnp.tanh(ga[:, 2 * H:3 * H]).astype(jnp.float32)
        o = jax.nn.sigmoid(ga[:, 3 * H:]).astype(jnp.float32)
        c = f * c + i * g
        h = o * jnp.tanh(c)
        mask = (t < audio_len)[:, None]
        outs.append(jnp.where(mask, h, 0.0))
    out = jnp.stack(outs, axis=1)                            # (B, T, H)
    T_eff = int(jnp.max(audio_len))
    out = out[:, :T_eff]                                     # pad_packed truncation
    a1 = jax.nn.relu(jnp.dot(out.astype(jnp.bfloat16), p["w1"],
                             preferred_element_type=jnp.float32) + p["b1"])
    a2 = jax.nn.relu(jnp.dot(a1.astype(jnp.bfloat16), p["w2"],
                             preferred_element_type=jnp.float32) + p["b2"])
    score = jnp.sum(a2 * p["w3row"], axis=-1, keepdims=True) + p["b3"]
    attn = jax.nn.softmax(score, axis=1)
    return jnp.sum(attn * out, axis=1)                       # (B, H)


if __name__ == "__main__":
    # Small but TPU-friendly demo. H = 128 (multiple of 128) keeps gate slices
    # lane-aligned and the output store lane-dense, per the perf review.
    B, T, Din, H = 16, 8, 16, 128
    key = jax.random.PRNGKey(0)
    k_x, k_p = jax.random.split(key)

    x = jax.random.normal(k_x, (B, T, Din), jnp.float32)
    audio_len = jnp.array([8, 8, 8, 7, 7, 6, 6, 5, 5, 4, 4, 3, 3, 2, 2, 1],
                          dtype=jnp.int32)   # descending (enforce_sorted)
    params = init_params(k_p, Din, H)

    # Run 1: f32 gate activations (v5e-safe), two batch blocks (v7x: one per
    # TensorCore) and two time chunks (exercises the carried-state time axis).
    out1 = audio_lstm_forward(x, audio_len, params,
                              block_b=8, block_t=4, bf16_act=False)
    out1 = jax.block_until_ready(out1)
    ref1 = reference_forward(x, audio_len, params, bf16_act=False)
    assert out1.shape == (B, H)
    err1 = jnp.max(jnp.abs(out1 - ref1))
    assert jnp.allclose(out1, ref1, atol=5e-3, rtol=5e-3), f"max abs err {err1}"

    # Run 2: bf16 gate activations (v6e/v7x EUP path), single batch block and
    # single time chunk (single-TC v5e/v6e tiling). Looser tolerance because
    # the transcendentals run in bf16.
    out2 = audio_lstm_forward(x, audio_len, params,
                              block_b=16, block_t=8, bf16_act=True)
    out2 = jax.block_until_ready(out2)
    ref2 = reference_forward(x, audio_len, params, bf16_act=True)
    err2 = jnp.max(jnp.abs(out2 - ref2))
    assert jnp.allclose(out2, ref2, atol=5e-2, rtol=5e-2), f"max abs err {err2}"

    print("KERNEL_OK")
</pallas_src>

<mosaic_0001>
module attributes {stable_mosaic.version = 11 : i64} {
  func.func @audio_lstm_kernel(%arg0: i32, %arg1: i32, %arg2: memref<4x8x16xbf16, #tpu.memory_space<vmem>>, %arg3: memref<8x1xi32, #tpu.memory_space<vmem>>, %arg4: memref<1xi32, #tpu.memory_space<smem>>, %arg5: memref<16x512xbf16, #tpu.memory_space<vmem>>, %arg6: memref<128x512xbf16, #tpu.memory_space<vmem>>, %arg7: memref<1x512xf32, #tpu.memory_space<vmem>>, %arg8: memref<128x64xbf16, #tpu.memory_space<vmem>>, %arg9: memref<1x64xf32, #tpu.memory_space<vmem>>, %arg10: memref<64x32xbf16, #tpu.memory_space<vmem>>, %arg11: memref<1x32xf32, #tpu.memory_space<vmem>>, %arg12: memref<1x32xf32, #tpu.memory_space<vmem>>, %arg13: memref<1x1xf32, #tpu.memory_space<vmem>>, %arg14: memref<8x128xf32, #tpu.memory_space<vmem>>, %arg15: memref<4x8x512xf32, #tpu.memory_space<vmem>>, %arg16: memref<8x128xf32, #tpu.memory_space<vmem>>, %arg17: memref<8x128xf32, #tpu.memory_space<vmem>>, %arg18: memref<8x1xf32, #tpu.memory_space<vmem>>, %arg19: memref<8x1xf32, #tpu.memory_space<vmem>>, %arg20: memref<8x128xf32, #tpu.memory_space<vmem>>) attributes {dimension_semantics = [#tpu.dimension_semantics<parallel>, #tpu.dimension_semantics<arbitrary>], iteration_bounds = array<i64: 2, 2>, scalar_prefetch = 0 : i64, scratch_operands = 6 : i64, tpu.core_type = #tpu.core_type<tc>, window_params = [{transform_indices = @transform_0, window_bounds = array<i64: 4, 8, 16>}, {transform_indices = @transform_1, window_bounds = array<i64: 8, 1>}, {transform_indices = @transform_2, window_bounds = array<i64: 1>}, {pipeline_mode = #tpu.pipeline_mode<synchronous>, transform_indices = @transform_3, window_bounds = array<i64: 16, 512>}, {pipeline_mode = #tpu.pipeline_mode<synchronous>, transform_indices = @transform_4, window_bounds = array<i64: 128, 512>}, {pipeline_mode = #tpu.pipeline_mode<synchronous>, transform_indices = @transform_5, window_bounds = array<i64: 1, 512>}, {pipeline_mode = #tpu.pipeline_mode<synchronous>, transform_indices = @transform_6, window_bounds = array<i64: 128, 64>}, {pipeline_mode = #tpu.pipeline_mode<synchronous>, transform_indices = @transform_7, window_bounds = array<i64: 1, 64>}, {pipeline_mode = #tpu.pipeline_mode<synchronous>, transform_indices = @transform_8, window_bounds = array<i64: 64, 32>}, {pipeline_mode = #tpu.pipeline_mode<synchronous>, transform_indices = @transform_9, window_bounds = array<i64: 1, 32>}, {pipeline_mode = #tpu.pipeline_mode<synchronous>, transform_indices = @transform_10, window_bounds = array<i64: 1, 32>}, {pipeline_mode = #tpu.pipeline_mode<synchronous>, transform_indices = @transform_11, window_bounds = array<i64: 1, 1>}, {transform_indices = @transform_12, window_bounds = array<i64: 8, 128>}]} {
    %c4_i32 = arith.constant 4 : i32
    %0 = arith.muli %arg1, %c4_i32 : i32
    %c0_i32 = arith.constant 0 : i32
    %1 = arith.cmpi eq, %arg1, %c0_i32 : i32
    %2 = arith.extui %1 : i1 to i32
    %cst = arith.constant -1.000000e+30 : f32
    %c0_i32_0 = arith.constant 0 : i32
    %3 = arith.cmpi ne, %2, %c0_i32_0 : i32
    scf.if %3 {
      %cst_101 = arith.constant 0.000000e+00 : f32
      %319 = vector.broadcast %cst_101 : f32 to vector<8x128xf32>
      %c0_102 = arith.constant 0 : index
      %c0_103 = arith.constant 0 : index
      %320 = vector.load %arg16[%c0_102, %c0_103] : memref<8x128xf32, #tpu.memory_space<vmem>>, vector<8x128xf32>
      tpu.vector_store %arg16[%c0_102, %c0_103], %319 {strides = array<i32>} : memref<8x128xf32, #tpu.memory_space<vmem>>, vector<8x128xf32>,
      %cst_104 = arith.constant 0.000000e+00 : f32
      %321 = vector.broadcast %cst_104 : f32 to vector<8x128xf32>
      %c0_105 = arith.constant 0 : index
      %c0_106 = arith.constant 0 : index
      %322 = vector.load %arg17[%c0_105, %c0_106] : memref<8x128xf32, #tpu.memory_space<vmem>>, vector<8x128xf32>
      tpu.vector_store %arg17[%c0_105, %c0_106], %321 {strides = array<i32>} : memref<8x128xf32, #tpu.memory_space<vmem>>, vector<8x128xf32>,
      %323 = vector.broadcast %cst : f32 to vector<8x1xf32>
      %c0_107 = arith.constant 0 : index
      %c0_108 = arith.constant 0 : index
      %324 = vector.load %arg18[%c0_107, %c0_108] : memref<8x1xf32, #tpu.memory_space<vmem>>, vector<8x1xf32>
      tpu.vector_store %arg18[%c0_107, %c0_108], %323 {strides = array<i32>} : memref<8x1xf32, #tpu.memory_space<vmem>>, vector<8x1xf32>,
      %cst_109 = arith.constant 0.000000e+00 : f32
      %325 = vector.broadcast %cst_109 : f32 to vector<8x1xf32>
      %c0_110 = arith.constant 0 : index
      %c0_111 = arith.constant 0 : index
      %326 = vector.load %arg19[%c0_110, %c0_111] : memref<8x1xf32, #tpu.memory_space<vmem>>, vector<8x1xf32>
      tpu.vector_store %arg19[%c0_110, %c0_111], %325 {strides = array<i32>} : memref<8x1xf32, #tpu.memory_space<vmem>>, vector<8x1xf32>,
      %cst_112 = arith.constant 0.000000e+00 : f32
      %327 = vector.broadcast %cst_112 : f32 to vector<8x128xf32>
      %c0_113 = arith.constant 0 : index
      %c0_114 = arith.constant 0 : index
      %328 = vector.load %arg20[%c0_113, %c0_114] : memref<8x128xf32, #tpu.memory_space<vmem>>, vector<8x128xf32>
      tpu.vector_store %arg20[%c0_113, %c0_114], %327 {strides = array<i32>} : memref<8x128xf32, #tpu.memory_space<vmem>>, vector<8x128xf32>,
    } else {
    }
    %c0 = arith.constant 0 : index
    %c0_1 = arith.constant 0 : index
    %c0_2 = arith.constant 0 : index
    %4 = vector.load %arg2[%c0, %c0_1, %c0_2] : memref<4x8x16xbf16, #tpu.memory_space<vmem>>, vector<4x8x16xbf16>
    %5 = vector.shape_cast %4 : vector<4x8x16xbf16> to vector<32x16xbf16>
    %c0_3 = arith.constant 0 : index
    %c0_4 = arith.constant 0 : index
    %6 = vector.load %arg5[%c0_3, %c0_4] : memref<16x512xbf16, #tpu.memory_space<vmem>>, vector<16x512xbf16>
    %cst_5 = arith.constant dense<0.000000e+00> : vector<32x512xf32>
    %7 = tpu.matmul %5, %6, %cst_5 {dimension_numbers = #tpu.dot_dimension_numbers<[1], [0], [0], [1], [0, 0, 1, 1], [], []>} : vector<32x16xbf16>, vector<16x512xbf16>, vector<32x512xf32> -> vector<32x512xf32>
    %c0_6 = arith.constant 0 : index
    %c0_7 = arith.constant 0 : index
    %8 = vector.load %arg7[%c0_6, %c0_7] : memref<1x512xf32, #tpu.memory_space<vmem>>, vector<1x512xf32>
    %9 = vector.broadcast %8 : vector<1x512xf32> to vector<32x512xf32>
    %10 = arith.addf %7, %9 : vector<32x512xf32>
    %11 = vector.shape_cast %10 : vector<32x512xf32> to vector<4x8x512xf32>
    %c0_8 = arith.constant 0 : index
    %c0_9 = arith.constant 0 : index
    %c0_10 = arith.constant 0 : index
    %12 = vector.load %arg15[%c0_8, %c0_9, %c0_10] : memref<4x8x512xf32, #tpu.memory_space<vmem>>, vector<4x8x512xf32>
    tpu.vector_store %arg15[%c0_8, %c0_9, %c0_10], %11 {strides = array<i32>} : memref<4x8x512xf32, #tpu.memory_space<vmem>>, vector<4x8x512xf32>,
    %c0_11 = arith.constant 0 : index
    %c0_12 = arith.constant 0 : index
    %13 = vector.load %arg3[%c0_11, %c0_12] : memref<8x1xi32, #tpu.memory_space<vmem>>, vector<8x1xi32>
    %c0_13 = arith.constant 0 : index
    %14 = memref.load %arg4[%c0_13] : memref<1xi32, #tpu.memory_space<smem>>
    %c0_14 = arith.constant 0 : index
    %c0_15 = arith.constant 0 : index
    %15 = vector.load %arg6[%c0_14, %c0_15] : memref<128x512xbf16, #tpu.memory_space<vmem>>, vector<128x512xbf16>
    %c0_16 = arith.constant 0 : index
    %c0_17 = arith.constant 0 : index
    %16 = vector.load %arg8[%c0_16, %c0_17] : memref<128x64xbf16, #tpu.memory_space<vmem>>, vector<128x64xbf16>
    %c0_18 = arith.constant 0 : index
    %c0_19 = arith.constant 0 : index
    %17 = vector.load %arg9[%c0_18, %c0_19] : memref<1x64xf32, #tpu.memory_space<vmem>>, vector<1x64xf32>
    %c0_20 = arith.constant 0 : index
    %c0_21 = arith.constant 0 : index
    %18 = vector.load %arg10[%c0_20, %c0_21] : memref<64x32xbf16, #tpu.memory_space<vmem>>, vector<64x32xbf16>
    %c0_22 = arith.constant 0 : index
    %c0_23 = arith.constant 0 : index
    %19 = vector.load %arg11[%c0_22, %c0_23] : memref<1x32xf32, #tpu.memory_space<vmem>>, vector<1x32xf32>
    %c0_24 = arith.constant 0 : index
    %c0_25 = arith.constant 0 : index
    %20 = vector.load %arg12[%c0_24, %c0_25] : memref<1x32xf32, #tpu.memory_space<vmem>>, vector<1x32xf32>
    %c0_26 = arith.constant 0 : index
    %c0_27 = arith.constant 0 : index
    %21 = vector.load %arg13[%c0_26, %c0_27] : memref<1x1xf32, #tpu.memory_space<vmem>>, vector<1x1xf32>
    %c0_28 = arith.constant 0 : index
    %c0_29 = arith.constant 0 : index
    %22 = vector.load %arg16[%c0_28, %c0_29] : memref<8x128xf32, #tpu.memory_space<vmem>>, vector<8x128xf32>
    %c0_30 = arith.constant 0 : index
    %c0_31 = arith.constant 0 : index
    %23 = vector.load %arg17[%c0_30, %c0_31] : memref<8x128xf32, #tpu.memory_space<vmem>>, vector<8x128xf32>
    %c0_32 = arith.constant 0 : index
    %c0_33 = arith.constant 0 : index
    %24 = vector.load %arg18[%c0_32, %c0_33] : memref<8x1xf32, #tpu.memory_space<vmem>>, vector<8x1xf32>
    %c0_34 = arith.constant 0 : index
    %c0_35 = arith.constant 0 : index
    %25 = vector.load %arg19[%c0_34, %c0_35] : memref<8x1xf32, #tpu.memory_space<vmem>>, vector<8x1xf32>
    %c0_36 = arith.constant 0 : index
    %c0_37 = arith.constant 0 : index
    %26 = vector.load %arg20[%c0_36, %c0_37] : memref<8x128xf32, #tpu.memory_space<vmem>>, vector<8x128xf32>
    %cst_38 = arith.constant -1.000000e+30 : f32
    %c0_i32_39 = arith.constant 0 : i32
    %27 = arith.addi %0, %c0_i32_39 : i32
    %28 = arith.index_cast %c0_i32_39 : i32 to index
    %c0_40 = arith.constant 0 : index
    %c0_41 = arith.constant 0 : index
    %29 = vector.load %arg15[%28, %c0_40, %c0_41] : memref<4x8x512xf32, #tpu.memory_space<vmem>>, vector<1x8x512xf32>
    %30 = vector.shape_cast %29 : vector<1x8x512xf32> to vector<8x512xf32>
    %31 = arith.truncf %22 : vector<8x128xf32> to vector<8x128xbf16>
    %cst_42 = arith.constant dense<0.000000e+00> : vector<8x512xf32>
    %32 = tpu.matmul %31, %15, %cst_42 {dimension_numbers = #tpu.dot_dimension_numbers<[1], [0], [0], [1], [0, 0, 1, 1], [], []>} : vector<8x128xbf16>, vector<128x512xbf16>, vector<8x512xf32> -> vector<8x512xf32>
    %33 = arith.addf %30, %32 : vector<8x512xf32>
    %34 = vector.extract_strided_slice %33 {offsets = [0, 0], sizes = [8, 128], strides = [1, 1]} : vector<8x512xf32> to vector<8x128xf32>
    %35 = arith.negf %34 : vector<8x128xf32>
    %36 = math.exp %35 : vector<8x128xf32>
    %cst_43 = arith.constant 1.000000e+00 : f32
    %37 = vector.broadcast %cst_43 : f32 to vector<8x128xf32>
    %38 = arith.addf %37, %36 : vector<8x128xf32>
    %39 = arith.divf %37, %38 : vector<8x128xf32>
    %40 = vector.extract_strided_slice %33 {offsets = [0, 128], sizes = [8, 128], strides = [1, 1]} : vector<8x512xf32> to vector<8x128xf32>
    %41 = arith.negf %40 : vector<8x128xf32>
    %42 = math.exp %41 : vector<8x128xf32>
    %cst_44 = arith.constant 1.000000e+00 : f32
    %43 = vector.broadcast %cst_44 : f32 to vector<8x128xf32>
    %44 = arith.addf %43, %42 : vector<8x128xf32>
    %45 = arith.divf %43, %44 : vector<8x128xf32>
    %46 = vector.extract_strided_slice %33 {offsets = [0, 256], sizes = [8, 128], strides = [1, 1]} : vector<8x512xf32> to vector<8x128xf32>
    %47 = math.tanh %46 : vector<8x128xf32>
    %48 = vector.extract_strided_slice %33 {offsets = [0, 384], sizes = [8, 128], strides = [1, 1]} : vector<8x512xf32> to vector<8x128xf32>
    %49 = arith.negf %48 : vector<8x128xf32>
    %50 = math.exp %49 : vector<8x128xf32>
    %cst_45 = arith.constant 1.000000e+00 : f32
    %51 = vector.broadcast %cst_45 : f32 to vector<8x128xf32>
    %52 = arith.addf %51, %50 : vector<8x128xf32>
    %53 = arith.divf %51, %52 : vector<8x128xf32>
    %54 = arith.mulf %45, %23 : vector<8x128xf32>
    %55 = arith.mulf %39, %47 : vector<8x128xf32>
    %56 = arith.addf %54, %55 : vector<8x128xf32>
    %57 = math.tanh %56 : vector<8x128xf32>
    %58 = arith.mulf %53, %57 : vector<8x128xf32>
    %59 = vector.broadcast %27 : i32 to vector<8x1xi32>
    %60 = arith.cmpi slt, %59, %13 : vector<8x1xi32>
    %cst_46 = arith.constant 0.000000e+00 : f32
    %61 = vector.shape_cast %60 : vector<8x1xi1> to vector<8x1xi1>
    %62 = vector.broadcast %61 : vector<8x1xi1> to vector<8x128xi1>
    %63 = vector.broadcast %cst_46 : f32 to vector<8x128xf32>
    %64 = arith.select %62, %58, %63 : vector<8x128xi1>, vector<8x128xf32>
    %65 = arith.truncf %64 : vector<8x128xf32> to vector<8x128xbf16>
    %cst_47 = arith.constant dense<0.000000e+00> : vector<8x64xf32>
    %66 = tpu.matmul %65, %16, %cst_47 {dimension_numbers = #tpu.dot_dimension_numbers<[1], [0], [0], [1], [0, 0, 1, 1], [], []>} : vector<8x128xbf16>, vector<128x64xbf16>, vector<8x64xf32> -> vector<8x64xf32>
    %67 = vector.broadcast %17 : vector<1x64xf32> to vector<8x64xf32>
    %68 = arith.addf %66, %67 : vector<8x64xf32>
    %cst_48 = arith.constant 0.000000e+00 : f32
    %69 = vector.broadcast %cst_48 : f32 to vector<8x64xf32>
    %70 = arith.maximumf %68, %69 : vector<8x64xf32>
    %71 = arith.truncf %70 : vector<8x64xf32> to vector<8x64xbf16>
    %cst_49 = arith.constant dense<0.000000e+00> : vector<8x32xf32>
    %72 = tpu.matmul %71, %18, %cst_49 {dimension_numbers = #tpu.dot_dimension_numbers<[1], [0], [0], [1], [0, 0, 1, 1], [], []>} : vector<8x64xbf16>, vector<64x32xbf16>, vector<8x32xf32> -> vector<8x32xf32>
    %73 = vector.broadcast %19 : vector<1x32xf32> to vector<8x32xf32>
    %74 = arith.addf %72, %73 : vector<8x32xf32>
    %cst_50 = arith.constant 0.000000e+00 : f32
    %75 = vector.broadcast %cst_50 : f32 to vector<8x32xf32>
    %76 = arith.maximumf %74, %75 : vector<8x32xf32>
    %77 = vector.broadcast %20 : vector<1x32xf32> to vector<8x32xf32>
    %78 = arith.mulf %76, %77 : vector<8x32xf32>
    %cst_51 = arith.constant dense<0.000000e+00> : vector<8xf32>
    %79 = vector.multi_reduction <add>, %78, %cst_51 [1] : vector<8x32xf32> to vector<8xf32>
    %80 = vector.shape_cast %79 : vector<8xf32> to vector<8x1xf32>
    %81 = vector.broadcast %21 : vector<1x1xf32> to vector<8x1xf32>
    %82 = arith.addf %80, %81 : vector<8x1xf32>
    %83 = arith.cmpi slt, %27, %14 : i32
    %84 = vector.broadcast %cst_38 : f32 to vector<8x1xf32>
    %85 = arith.select %83, %82, %84 : vector<8x1xf32>
    %86 = arith.maximumf %24, %85 : vector<8x1xf32>
    %87 = arith.subf %24, %86 : vector<8x1xf32>
    %88 = math.exp %87 : vector<8x1xf32>
    %89 = arith.subf %85, %86 : vector<8x1xf32>
    %90 = math.exp %89 : vector<8x1xf32>
    %91 = arith.mulf %88, %25 : vector<8x1xf32>
    %92 = arith.addf %91, %90 : vector<8x1xf32>
    %93 = vector.broadcast %88 : vector<8x1xf32> to vector<8x128xf32>
    %94 = arith.mulf %93, %26 : vector<8x128xf32>
    %95 = vector.broadcast %90 : vector<8x1xf32> to vector<8x128xf32>
    %96 = arith.mulf %95, %64 : vector<8x128xf32>
    %97 = arith.addf %94, %96 : vector<8x128xf32>
    %c1_i32 = arith.constant 1 : i32
    %98 = arith.addi %0, %c1_i32 : i32
    %99 = arith.index_cast %c1_i32 : i32 to index
    %c0_52 = arith.constant 0 : index
    %c0_53 = arith.constant 0 : index
    %100 = vector.load %arg15[%99, %c0_52, %c0_53] : memref<4x8x512xf32, #tpu.memory_space<vmem>>, vector<1x8x512xf32>
    %101 = vector.shape_cast %100 : vector<1x8x512xf32> to vector<8x512xf32>
    %102 = arith.truncf %58 : vector<8x128xf32> to vector<8x128xbf16>
    %cst_54 = arith.constant dense<0.000000e+00> : vector<8x512xf32>
    %103 = tpu.matmul %102, %15, %cst_54 {dimension_numbers = #tpu.dot_dimension_numbers<[1], [0], [0], [1], [0, 0, 1, 1], [], []>} : vector<8x128xbf16>, vector<128x512xbf16>, vector<8x512xf32> -> vector<8x512xf32>
    %104 = arith.addf %101, %103 : vector<8x512xf32>
    %105 = vector.extract_strided_slice %104 {offsets = [0, 0], sizes = [8, 128], strides = [1, 1]} : vector<8x512xf32> to vector<8x128xf32>
    %106 = arith.negf %105 : vector<8x128xf32>
    %107 = math.exp %106 : vector<8x128xf32>
    %cst_55 = arith.constant 1.000000e+00 : f32
    %108 = vector.broadcast %cst_55 : f32 to vector<8x128xf32>
    %109 = arith.addf %108, %107 : vector<8x128xf32>
    %110 = arith.divf %108, %109 : vector<8x128xf32>
    %111 = vector.extract_strided_slice %104 {offsets = [0, 128], sizes = [8, 128], strides = [1, 1]} : vector<8x512xf32> to vector<8x128xf32>
    %112 = arith.negf %111 : vector<8x128xf32>
    %113 = math.exp %112 : vector<8x128xf32>
    %cst_56 = arith.constant 1.000000e+00 : f32
    %114 = vector.broadcast %cst_56 : f32 to vector<8x128xf32>
    %115 = arith.addf %114, %113 : vector<8x128xf32>
    %116 = arith.divf %114, %115 : vector<8x128xf32>
    %117 = vector.extract_strided_slice %104 {offsets = [0, 256], sizes = [8, 128], strides = [1, 1]} : vector<8x512xf32> to vector<8x128xf32>
    %118 = math.tanh %117 : vector<8x128xf32>
    %119 = vector.extract_strided_slice %104 {offsets = [0, 384], sizes = [8, 128], strides = [1, 1]} : vector<8x512xf32> to vector<8x128xf32>
    %120 = arith.negf %119 : vector<8x128xf32>
    %121 = math.exp %120 : vector<8x128xf32>
    %cst_57 = arith.constant 1.000000e+00 : f32
    %122 = vector.broadcast %cst_57 : f32 to vector<8x128xf32>
    %123 = arith.addf %122, %121 : vector<8x128xf32>
    %124 = arith.divf %122, %123 : vector<8x128xf32>
    %125 = arith.mulf %116, %56 : vector<8x128xf32>
    %126 = arith.mulf %110, %118 : vector<8x128xf32>
    %127 = arith.addf %125, %126 : vector<8x128xf32>
    %128 = math.tanh %127 : vector<8x128xf32>
    %129 = arith.mulf %124, %128 : vector<8x128xf32>
    %130 = vector.broadcast %98 : i32 to vector<8x1xi32>
    %131 = arith.cmpi slt, %130, %13 : vector<8x1xi32>
    %cst_58 = arith.constant 0.000000e+00 : f32
    %132 = vector.shape_cast %131 : vector<8x1xi1> to vector<8x1xi1>
    %133 = vector.broadcast %132 : vector<8x1xi1> to vector<8x128xi1>
    %134 = vector.broadcast %cst_58 : f32 to vector<8x128xf32>
    %135 = arith.select %133, %129, %134 : vector<8x128xi1>, vector<8x128xf32>
    %136 = arith.truncf %135 : vector<8x128xf32> to vector<8x128xbf16>
    %cst_59 = arith.constant dense<0.000000e+00> : vector<8x64xf32>
    %137 = tpu.matmul %136, %16, %cst_59 {dimension_numbers = #tpu.dot_dimension_numbers<[1], [0], [0], [1], [0, 0, 1, 1], [], []>} : vector<8x128xbf16>, vector<128x64xbf16>, vector<8x64xf32> -> vector<8x64xf32>
    %138 = vector.broadcast %17 : vector<1x64xf32> to vector<8x64xf32>
    %139 = arith.addf %137, %138 : vector<8x64xf32>
    %cst_60 = arith.constant 0.000000e+00 : f32
    %140 = vector.broadcast %cst_60 : f32 to vector<8x64xf32>
    %141 = arith.maximumf %139, %140 : vector<8x64xf32>
    %142 = arith.truncf %141 : vector<8x64xf32> to vector<8x64xbf16>
    %cst_61 = arith.constant dense<0.000000e+00> : vector<8x32xf32>
    %143 = tpu.matmul %142, %18, %cst_61 {dimension_numbers = #tpu.dot_dimension_numbers<[1], [0], [0], [1], [0, 0, 1, 1], [], []>} : vector<8x64xbf16>, vector<64x32xbf16>, vector<8x32xf32> -> vector<8x32xf32>
    %144 = vector.broadcast %19 : vector<1x32xf32> to vector<8x32xf32>
    %145 = arith.addf %143, %144 : vector<8x32xf32>
    %cst_62 = arith.constant 0.000000e+00 : f32
    %146 = vector.broadcast %cst_62 : f32 to vector<8x32xf32>
    %147 = arith.maximumf %145, %146 : vector<8x32xf32>
    %148 = vector.broadcast %20 : vector<1x32xf32> to vector<8x32xf32>
    %149 = arith.mulf %147, %148 : vector<8x32xf32>
    %cst_63 = arith.constant dense<0.000000e+00> : vector<8xf32>
    %150 = vector.multi_reduction <add>, %149, %cst_63 [1] : vector<8x32xf32> to vector<8xf32>
    %151 = vector.shape_cast %150 : vector<8xf32> to vector<8x1xf32>
    %152 = vector.broadcast %21 : vector<1x1xf32> to vector<8x1xf32>
    %153 = arith.addf %151, %152 : vector<8x1xf32>
    %154 = arith.cmpi slt, %98, %14 : i32
    %155 = vector.broadcast %cst_38 : f32 to vector<8x1xf32>
    %156 = arith.select %154, %153, %155 : vector<8x1xf32>
    %157 = arith.maximumf %86, %156 : vector<8x1xf32>
    %158 = arith.subf %86, %157 : vector<8x1xf32>
    %159 = math.exp %158 : vector<8x1xf32>
    %160 = arith.subf %156, %157 : vector<8x1xf32>
    %161 = math.exp %160 : vector<8x1xf32>
    %162 = arith.mulf %159, %92 : vector<8x1xf32>
    %163 = arith.addf %162, %161 : vector<8x1xf32>
    %164 = vector.broadcast %159 : vector<8x1xf32> to vector<8x128xf32>
    %165 = arith.mulf %164, %97 : vector<8x128xf32>
    %166 = vector.broadcast %161 : vector<8x1xf32> to vector<8x128xf32>
    %167 = arith.mulf %166, %135 : vector<8x128xf32>
    %168 = arith.addf %165, %167 : vector<8x128xf32>
    %c2_i32 = arith.constant 2 : i32
    %169 = arith.addi %0, %c2_i32 : i32
    %170 = arith.index_cast %c2_i32 : i32 to index
    %c0_64 = arith.constant 0 : index
    %c0_65 = arith.constant 0 : index
    %171 = vector.load %arg15[%170, %c0_64, %c0_65] : memref<4x8x512xf32, #tpu.memory_space<vmem>>, vector<1x8x512xf32>
    %172 = vector.shape_cast %171 : vector<1x8x512xf32> to vector<8x512xf32>
    %173 = arith.truncf %129 : vector<8x128xf32> to vector<8x128xbf16>
    %cst_66 = arith.constant dense<0.000000e+00> : vector<8x512xf32>
    %174 = tpu.matmul %173, %15, %cst_66 {dimension_numbers = #tpu.dot_dimension_numbers<[1], [0], [0], [1], [0, 0, 1, 1], [], []>} : vector<8x128xbf16>, vector<128x512xbf16>, vector<8x512xf32> -> vector<8x512xf32>
    %175 = arith.addf %172, %174 : vector<8x512xf32>
    %176 = vector.extract_strided_slice %175 {offsets = [0, 0], sizes = [8, 128], strides = [1, 1]} : vector<8x512xf32> to vector<8x128xf32>
    %177 = arith.negf %176 : vector<8x128xf32>
    %178 = math.exp %177 : vector<8x128xf32>
    %cst_67 = arith.constant 1.000000e+00 : f32
    %179 = vector.broadcast %cst_67 : f32 to vector<8x128xf32>
    %180 = arith.addf %179, %178 : vector<8x128xf32>
    %181 = arith.divf %179, %180 : vector<8x128xf32>
    %182 = vector.extract_strided_slice %175 {offsets = [0, 128], sizes = [8, 128], strides = [1, 1]} : vector<8x512xf32> to vector<8x128xf32>
    %183 = arith.negf %182 : vector<8x128xf32>
    %184 = math.exp %183 : vector<8x128xf32>
    %cst_68 = arith.constant 1.000000e+00 : f32
    %185 = vector.broadcast %cst_68 : f32 to vector<8x128xf32>
    %186 = arith.addf %185, %184 : vector<8x128xf32>
    %187 = arith.divf %185, %186 : vector<8x128xf32>
    %188 = vector.extract_strided_slice %175 {offsets = [0, 256], sizes = [8, 128], strides = [1, 1]} : vector<8x512xf32> to vector<8x128xf32>
    %189 = math.tanh %188 : vector<8x128xf32>
    %190 = vector.extract_strided_slice %175 {offsets = [0, 384], sizes = [8, 128], strides = [1, 1]} : vector<8x512xf32> to vector<8x128xf32>
    %191 = arith.negf %190 : vector<8x128xf32>
    %192 = math.exp %191 : vector<8x128xf32>
    %cst_69 = arith.constant 1.000000e+00 : f32
    %193 = vector.broadcast %cst_69 : f32 to vector<8x128xf32>
    %194 = arith.addf %193, %192 : vector<8x128xf32>
    %195 = arith.divf %193, %194 : vector<8x128xf32>
    %196 = arith.mulf %187, %127 : vector<8x128xf32>
    %197 = arith.mulf %181, %189 : vector<8x128xf32>
    %198 = arith.addf %196, %197 : vector<8x128xf32>
    %199 = math.tanh %198 : vector<8x128xf32>
    %200 = arith.mulf %195, %199 : vector<8x128xf32>
    %201 = vector.broadcast %169 : i32 to vector<8x1xi32>
    %202 = arith.cmpi slt, %201, %13 : vector<8x1xi32>
    %cst_70 = arith.constant 0.000000e+00 : f32
    %203 = vector.shape_cast %202 : vector<8x1xi1> to vector<8x1xi1>
    %204 = vector.broadcast %203 : vector<8x1xi1> to vector<8x128xi1>
    %205 = vector.broadcast %cst_70 : f32 to vector<8x128xf32>
    %206 = arith.select %204, %200, %205 : vector<8x128xi1>, vector<8x128xf32>
    %207 = arith.truncf %206 : vector<8x128xf32> to vector<8x128xbf16>
    %cst_71 = arith.constant dense<0.000000e+00> : vector<8x64xf32>
    %208 = tpu.matmul %207, %16, %cst_71 {dimension_numbers = #tpu.dot_dimension_numbers<[1], [0], [0], [1], [0, 0, 1, 1], [], []>} : vector<8x128xbf16>, vector<128x64xbf16>, vector<8x64xf32> -> vector<8x64xf32>
    %209 = vector.broadcast %17 : vector<1x64xf32> to vector<8x64xf32>
    %210 = arith.addf %208, %209 : vector<8x64xf32>
    %cst_72 = arith.constant 0.000000e+00 : f32
    %211 = vector.broadcast %cst_72 : f32 to vector<8x64xf32>
    %212 = arith.maximumf %210, %211 : vector<8x64xf32>
    %213 = arith.truncf %212 : vector<8x64xf32> to vector<8x64xbf16>
    %cst_73 = arith.constant dense<0.000000e+00> : vector<8x32xf32>
    %214 = tpu.matmul %213, %18, %cst_73 {dimension_numbers = #tpu.dot_dimension_numbers<[1], [0], [0], [1], [0, 0, 1, 1], [], []>} : vector<8x64xbf16>, vector<64x32xbf16>, vector<8x32xf32> -> vector<8x32xf32>
    %215 = vector.broadcast %19 : vector<1x32xf32> to vector<8x32xf32>
    %216 = arith.addf %214, %215 : vector<8x32xf32>
    %cst_74 = arith.constant 0.000000e+00 : f32
    %217 = vector.broadcast %cst_74 : f32 to vector<8x32xf32>
    %218 = arith.maximumf %216, %217 : vector<8x32xf32>
    %219 = vector.broadcast %20 : vector<1x32xf32> to vector<8x32xf32>
    %220 = arith.mulf %218, %219 : vector<8x32xf32>
    %cst_75 = arith.constant dense<0.000000e+00> : vector<8xf32>
    %221 = vector.multi_reduction <add>, %220, %cst_75 [1] : vector<8x32xf32> to vector<8xf32>
    %222 = vector.shape_cast %221 : vector<8xf32> to vector<8x1xf32>
    %223 = vector.broadcast %21 : vector<1x1xf32> to vector<8x1xf32>
    %224 = arith.addf %222, %223 : vector<8x1xf32>
    %225 = arith.cmpi slt, %169, %14 : i32
    %226 = vector.broadcast %cst_38 : f32 to vector<8x1xf32>
    %227 = arith.select %225, %224, %226 : vector<8x1xf32>
    %228 = arith.maximumf %157, %227 : vector<8x1xf32>
    %229 = arith.subf %157, %228 : vector<8x1xf32>
    %230 = math.exp %229 : vector<8x1xf32>
    %231 = arith.subf %227, %228 : vector<8x1xf32>
    %232 = math.exp %231 : vector<8x1xf32>
    %233 = arith.mulf %230, %163 : vector<8x1xf32>
    %234 = arith.addf %233, %232 : vector<8x1xf32>
    %235 = vector.broadcast %230 : vector<8x1xf32> to vector<8x128xf32>
    %236 = arith.mulf %235, %168 : vector<8x128xf32>
    %237 = vector.broadcast %232 : vector<8x1xf32> to vector<8x128xf32>
    %238 = arith.mulf %237, %206 : vector<8x128xf32>
    %239 = arith.addf %236, %238 : vector<8x128xf32>
    %c3_i32 = arith.constant 3 : i32
    %240 = arith.addi %0, %c3_i32 : i32
    %241 = arith.index_cast %c3_i32 : i32 to index
    %c0_76 = arith.constant 0 : index
    %c0_77 = arith.constant 0 : index
    %242 = vector.load %arg15[%241, %c0_76, %c0_77] : memref<4x8x512xf32, #tpu.memory_space<vmem>>, vector<1x8x512xf32>
    %243 = vector.shape_cast %242 : vector<1x8x512xf32> to vector<8x512xf32>
    %244 = arith.truncf %200 : vector<8x128xf32> to vector<8x128xbf16>
    %cst_78 = arith.constant dense<0.000000e+00> : vector<8x512xf32>
    %245 = tpu.matmul %244, %15, %cst_78 {dimension_numbers = #tpu.dot_dimension_numbers<[1], [0], [0], [1], [0, 0, 1, 1], [], []>} : vector<8x128xbf16>, vector<128x512xbf16>, vector<8x512xf32> -> vector<8x512xf32>
    %246 = arith.addf %243, %245 : vector<8x512xf32>
    %247 = vector.extract_strided_slice %246 {offsets = [0, 0], sizes = [8, 128], strides = [1, 1]} : vector<8x512xf32> to vector<8x128xf32>
    %248 = arith.negf %247 : vector<8x128xf32>
    %249 = math.exp %248 : vector<8x128xf32>
    %cst_79 = arith.constant 1.000000e+00 : f32
    %250 = vector.broadcast %cst_79 : f32 to vector<8x128xf32>
    %251 = arith.addf %250, %249 : vector<8x128xf32>
    %252 = arith.divf %250, %251 : vector<8x128xf32>
    %253 = vector.extract_strided_slice %246 {offsets = [0, 128], sizes = [8, 128], strides = [1, 1]} : vector<8x512xf32> to vector<8x128xf32>
    %254 = arith.negf %253 : vector<8x128xf32>
    %255 = math.exp %254 : vector<8x128xf32>
    %cst_80 = arith.constant 1.000000e+00 : f32
    %256 = vector.broadcast %cst_80 : f32 to vector<8x128xf32>
    %257 = arith.addf %256, %255 : vector<8x128xf32>
    %258 = arith.divf %256, %257 : vector<8x128xf32>
    %259 = vector.extract_strided_slice %246 {offsets = [0, 256], sizes = [8, 128], strides = [1, 1]} : vector<8x512xf32> to vector<8x128xf32>
    %260 = math.tanh %259 : vector<8x128xf32>
    %261 = vector.extract_strided_slice %246 {offsets = [0, 384], sizes = [8, 128], strides = [1, 1]} : vector<8x512xf32> to vector<8x128xf32>
    %262 = arith.negf %261 : vector<8x128xf32>
    %263 = math.exp %262 : vector<8x128xf32>
    %cst_81 = arith.constant 1.000000e+00 : f32
    %264 = vector.broadcast %cst_81 : f32 to vector<8x128xf32>
    %265 = arith.addf %264, %263 : vector<8x128xf32>
    %266 = arith.divf %264, %265 : vector<8x128xf32>
    %267 = arith.mulf %258, %198 : vector<8x128xf32>
    %268 = arith.mulf %252, %260 : vector<8x128xf32>
    %269 = arith.addf %267, %268 : vector<8x128xf32>
    %270 = math.tanh %269 : vector<8x128xf32>
    %271 = arith.mulf %266, %270 : vector<8x128xf32>
    %272 = vector.broadcast %240 : i32 to vector<8x1xi32>
    %273 = arith.cmpi slt, %272, %13 : vector<8x1xi32>
    %cst_82 = arith.constant 0.000000e+00 : f32
    %274 = vector.shape_cast %273 : vector<8x1xi1> to vector<8x1xi1>
    %275 = vector.broadcast %274 : vector<8x1xi1> to vector<8x128xi1>
    %276 = vector.broadcast %cst_82 : f32 to vector<8x128xf32>
    %277 = arith.select %275, %271, %276 : vector<8x128xi1>, vector<8x128xf32>
    %278 = arith.truncf %277 : vector<8x128xf32> to vector<8x128xbf16>
    %cst_83 = arith.constant dense<0.000000e+00> : vector<8x64xf32>
    %279 = tpu.matmul %278, %16, %cst_83 {dimension_numbers = #tpu.dot_dimension_numbers<[1], [0], [0], [1], [0, 0, 1, 1], [], []>} : vector<8x128xbf16>, vector<128x64xbf16>, vector<8x64xf32> -> vector<8x64xf32>
    %280 = vector.broadcast %17 : vector<1x64xf32> to vector<8x64xf32>
    %281 = arith.addf %279, %280 : vector<8x64xf32>
    %cst_84 = arith.constant 0.000000e+00 : f32
    %282 = vector.broadcast %cst_84 : f32 to vector<8x64xf32>
    %283 = arith.maximumf %281, %282 : vector<8x64xf32>
    %284 = arith.truncf %283 : vector<8x64xf32> to vector<8x64xbf16>
    %cst_85 = arith.constant dense<0.000000e+00> : vector<8x32xf32>
    %285 = tpu.matmul %284, %18, %cst_85 {dimension_numbers = #tpu.dot_dimension_numbers<[1], [0], [0], [1], [0, 0, 1, 1], [], []>} : vector<8x64xbf16>, vector<64x32xbf16>, vector<8x32xf32> -> vector<8x32xf32>
    %286 = vector.broadcast %19 : vector<1x32xf32> to vector<8x32xf32>
    %287 = arith.addf %285, %286 : vector<8x32xf32>
    %cst_86 = arith.constant 0.000000e+00 : f32
    %288 = vector.broadcast %cst_86 : f32 to vector<8x32xf32>
    %289 = arith.maximumf %287, %288 : vector<8x32xf32>
    %290 = vector.broadcast %20 : vector<1x32xf32> to vector<8x32xf32>
    %291 = arith.mulf %289, %290 : vector<8x32xf32>
    %cst_87 = arith.constant dense<0.000000e+00> : vector<8xf32>
    %292 = vector.multi_reduction <add>, %291, %cst_87 [1] : vector<8x32xf32> to vector<8xf32>
    %293 = vector.shape_cast %292 : vector<8xf32> to vector<8x1xf32>
    %294 = vector.broadcast %21 : vector<1x1xf32> to vector<8x1xf32>
    %295 = arith.addf %293, %294 : vector<8x1xf32>
    %296 = arith.cmpi slt, %240, %14 : i32
    %297 = vector.broadcast %cst_38 : f32 to vector<8x1xf32>
    %298 = arith.select %296, %295, %297 : vector<8x1xf32>
    %299 = arith.maximumf %228, %298 : vector<8x1xf32>
    %300 = arith.subf %228, %299 : vector<8x1xf32>
    %301 = math.exp %300 : vector<8x1xf32>
    %302 = arith.subf %298, %299 : vector<8x1xf32>
    %303 = math.exp %302 : vector<8x1xf32>
    %304 = arith.mulf %301, %234 : vector<8x1xf32>
    %305 = arith.addf %304, %303 : vector<8x1xf32>
    %306 = vector.broadcast %301 : vector<8x1xf32> to vector<8x128xf32>
    %307 = arith.mulf %306, %239 : vector<8x128xf32>
    %308 = vector.broadcast %303 : vector<8x1xf32> to vector<8x128xf32>
    %309 = arith.mulf %308, %277 : vector<8x128xf32>
    %310 = arith.addf %307, %309 : vector<8x128xf32>
    %c4_i32_88 = arith.constant 4 : i32
    %c0_89 = arith.constant 0 : index
    %c0_90 = arith.constant 0 : index
    %311 = vector.load %arg16[%c0_89, %c0_90] : memref<8x128xf32, #tpu.memory_space<vmem>>, vector<8x128xf32>
    tpu.vector_store %arg16[%c0_89, %c0_90], %271 {strides = array<i32>} : memref<8x128xf32, #tpu.memory_space<vmem>>, vector<8x128xf32>,
    %c0_91 = arith.constant 0 : index
    %c0_92 = arith.constant 0 : index
    %312 = vector.load %arg17[%c0_91, %c0_92] : memref<8x128xf32, #tpu.memory_space<vmem>>, vector<8x128xf32>
    tpu.vector_store %arg17[%c0_91, %c0_92], %269 {strides = array<i32>} : memref<8x128xf32, #tpu.memory_space<vmem>>, vector<8x128xf32>,
    %c0_93 = arith.constant 0 : index
    %c0_94 = arith.constant 0 : index
    %313 = vector.load %arg18[%c0_93, %c0_94] : memref<8x1xf32, #tpu.memory_space<vmem>>, vector<8x1xf32>
    tpu.vector_store %arg18[%c0_93, %c0_94], %299 {strides = array<i32>} : memref<8x1xf32, #tpu.memory_space<vmem>>, vector<8x1xf32>,
    %c0_95 = arith.constant 0 : index
    %c0_96 = arith.constant 0 : index
    %314 = vector.load %arg19[%c0_95, %c0_96] : memref<8x1xf32, #tpu.memory_space<vmem>>, vector<8x1xf32>
    tpu.vector_store %arg19[%c0_95, %c0_96], %305 {strides = array<i32>} : memref<8x1xf32, #tpu.memory_space<vmem>>, vector<8x1xf32>,
    %c0_97 = arith.constant 0 : index
    %c0_98 = arith.constant 0 : index
    %315 = vector.load %arg20[%c0_97, %c0_98] : memref<8x128xf32, #tpu.memory_space<vmem>>, vector<8x128xf32>
    tpu.vector_store %arg20[%c0_97, %c0_98], %310 {strides = array<i32>} : memref<8x128xf32, #tpu.memory_space<vmem>>, vector<8x128xf32>,
    %c1_i32_99 = arith.constant 1 : i32
    %316 = arith.cmpi eq, %arg1, %c1_i32_99 : i32
    %317 = arith.extui %316 : i1 to i32
    %c0_i32_100 = arith.constant 0 : i32
    %318 = arith.cmpi ne, %317, %c0_i32_100 : i32
    scf.if %318 {
      %319 = tpu.reciprocal %305 {approx = true} : vector<8x1xf32> -> vector<8x1xf32>
      %320 = vector.broadcast %319 : vector<8x1xf32> to vector<8x128xf32>
      %321 = arith.mulf %310, %320 : vector<8x128xf32>
      %c0_101 = arith.constant 0 : index
      %c0_102 = arith.constant 0 : index
      %322 = vector.load %arg14[%c0_101, %c0_102] : memref<8x128xf32, #tpu.memory_space<vmem>>, vector<8x128xf32>
      tpu.vector_store %arg14[%c0_101, %c0_102], %321 {strides = array<i32>} : memref<8x128xf32, #tpu.memory_space<vmem>>, vector<8x128xf32>,
    } else {
    }
    return
  }
  func.func @transform_0(%arg0: i32, %arg1: i32) -> (i32, i32, i32) {
    %c0_i32 = arith.constant 0 : i32
    %c0_i32_0 = arith.constant 0 : i32
    return %arg1, %arg0, %c0_i32 : i32, i32, i32
  }
  func.func @transform_1(%arg0: i32, %arg1: i32) -> (i32, i32) {
    %c0_i32 = arith.constant 0 : i32
    %c0_i32_0 = arith.constant 0 : i32
    return %arg0, %c0_i32 : i32, i32
  }
  func.func @transform_2(%arg0: i32, %arg1: i32) -> i32 {
    %c0_i32 = arith.constant 0 : i32
    %c0_i32_0 = arith.constant 0 : i32
    return %c0_i32 : i32
  }
  func.func @transform_3(%arg0: i32, %arg1: i32) -> (i32, i32) {
    %c0_i32 = arith.constant 0 : i32
    %c0_i32_0 = arith.constant 0 : i32
    %c0_i32_1 = arith.constant 0 : i32
    return %c0_i32, %c0_i32_0 : i32, i32
  }
  func.func @transform_4(%arg0: i32, %arg1: i32) -> (i32, i32) {
    %c0_i32 = arith.constant 0 : i32
    %c0_i32_0 = arith.constant 0 : i32
    %c0_i32_1 = arith.constant 0 : i32
    return %c0_i32, %c0_i32_0 : i32, i32
  }
  func.func @transform_5(%arg0: i32, %arg1: i32) -> (i32, i32) {
    %c0_i32 = arith.constant 0 : i32
    %c0_i32_0 = arith.constant 0 : i32
    %c0_i32_1 = arith.constant 0 : i32
    return %c0_i32, %c0_i32_0 : i32, i32
  }
  func.func @transform_6(%arg0: i32, %arg1: i32) -> (i32, i32) {
    %c0_i32 = arith.constant 0 : i32
    %c0_i32_0 = arith.constant 0 : i32
    %c0_i32_1 = arith.constant 0 : i32
    return %c0_i32, %c0_i32_0 : i32, i32
  }
  func.func @transform_7(%arg0: i32, %arg1: i32) -> (i32, i32) {
    %c0_i32 = arith.constant 0 : i32
    %c0_i32_0 = arith.constant 0 : i32
    %c0_i32_1 = arith.constant 0 : i32
    return %c0_i32, %c0_i32_0 : i32, i32
  }
  func.func @transform_8(%arg0: i32, %arg1: i32) -> (i32, i32) {
    %c0_i32 = arith.constant 0 : i32
    %c0_i32_0 = arith.constant 0 : i32
    %c0_i32_1 = arith.constant 0 : i32
    return %c0_i32, %c0_i32_0 : i32, i32
  }
  func.func @transform_9(%arg0: i32, %arg1: i32) -> (i32, i32) {
    %c0_i32 = arith.constant 0 : i32
    %c0_i32_0 = arith.constant 0 : i32
    %c0_i32_1 = arith.constant 0 : i32
    return %c0_i32, %c0_i32_0 : i32, i32
  }
  func.func @transform_10(%arg0: i32, %arg1: i32) -> (i32, i32) {
    %c0_i32 = arith.constant 0 : i32
    %c0_i32_0 = arith.constant 0 : i32
    %c0_i32_1 = arith.constant 0 : i32
    return %c0_i32, %c0_i32_0 : i32, i32
  }
  func.func @transform_11(%arg0: i32, %arg1: i32) -> (i32, i32) {
    %c0_i32 = arith.constant 0 : i32
    %c0_i32_0 = arith.constant 0 : i32
    %c0_i32_1 = arith.constant 0 : i32
    return %c0_i32, %c0_i32_0 : i32, i32
  }
  func.func @transform_12(%arg0: i32, %arg1: i32) -> (i32, i32) {
    %c0_i32 = arith.constant 0 : i32
    %c0_i32_0 = arith.constant 0 : i32
    return %arg0, %c0_i32 : i32, i32
  }
}

</mosaic_0001>

<bundles_post_ra>
// kernel: audio_lstm_forward.1
= control target key start
LH: loop header
LB: loop body
LE: loop exit
PB: predicated region body
PF: predicated region fallthrough
CT: control target
= control target key end

     0   :  { %s3820_s0 = inlined_call_operand.vmem [shape: bf16[8,16,16], index: 0, kind: input, shape index: {}]   ;;  %s3821_s1 = inlined_call_operand.vmem [shape: s32[16,1], index: 1, kind: input, shape index: {}]   ;;  %s3822_s2 = inlined_call_operand.<no memory space> [shape: s32[1], index: 2, kind: input, shape index: {}]   ;;  %s3823_s3 = inlined_call_operand.vmem [shape: bf16[16,512], index: 3, kind: input, shape index: {}]   ;;  %s3824_s4 = inlined_call_operand.vmem [shape: bf16[128,512], index: 4, kind: input, shape index: {}]   ;;  %s3825_s5 = inlined_call_operand.vmem [shape: f32[1,512], index: 5, kind: input, shape index: {}]   ;;  %s3826_s6 = inlined_call_operand.vmem [shape: bf16[128,64], index: 6, kind: input, shape index: {}]   ;;  %s3827_s7 = inlined_call_operand.vmem [shape: f32[1,64], index: 7, kind: input, shape index: {}]   ;;  %s3828_s8 = inlined_call_operand.vmem [shape: bf16[64,32], index: 8, kind: input, shape index: {}]   ;;  %s3829_s9 = inlined_call_operand.vmem [shape: f32[1,32], index: 9, kind: input, shape index: {}]   ;;  %s3830_s10 = inlined_call_operand.vmem [shape: f32[1,32], index: 10, kind: input, shape index: {}]   ;;  %s3831_s11 = inlined_call_operand.<no memory space> [shape: f32[1,1], index: 11, kind: input, shape index: {}]   ;;  %s3832_s12 = inlined_call_operand.hbm [shape: f32[16,128], index: 12, kind: output, shape index: {}]  }
   0x1   :  { %3872 = sst [smem:[#allocation40_spill]] %s3820_s0  ;;  %v18_v0 = vstv %s3831_s11 }
   0x2   :  { %3873 = sst [smem:[#allocation41_spill]] %s3821_s1  ;;  %19 = vst [vmem:[#allocation9] sm:$0x1] %v18_v0 }
   0x3   :  { %3874 = sst [smem:[#allocation42_spill]] %s3823_s3 }
   0x4   :  { %3875 = sst [smem:[#allocation43_spill]] %s3830_s10 }
   0x5   :  { %3876 = sst [smem:[#allocation44_spill]] %s3832_s12 }
   0x6   :  { %17 = sst [smem:[#allocation8]] %s3822_s2 }
   0x7   :  { %20 = vsyncpa [#allocation12], 0 }
   0x8   :  { %22 = vsyncpa [#allocation12 + $0x1], 0  ;;  %s2872_s25 = smov 0   ;;  %s2874_s26 = smov 0  }
   0x9   :  { %s2876_s27 = smov 0   ;;  %s2878_s28 = smov 0  }
   0xa   :  { %s2880_s29 = smov 0   ;;  %s2882_s30 = smov 0  }
   0xb   :  { %s2884_s2 = smov 0   ;;  %s2886_s13 = smov 0  }
   0xc   :  { %s2888_s11 = smov 0   ;;  %s2890_s14 = smov 0  }
   0xd LB: > { %3877 = sst [smem:[#allocation14_spill]] %s2756_s25  ;;  %s2125_s15 = sadd.s32 4294967295, %s2792_s14   ;;  %s2792_s14 = sphi %s2890_s14, %s28_s14   ;;  %s2788_s11 = sphi %s2888_s11, %s3963_s11   ;;  %s2784_s13 = sphi %s2886_s13, %s3962_s13   ;;  %s2780_s2 = sphi %s2884_s2, %s3961_s2   ;;  %s2776_s30 = sphi %s2882_s30, %s3960_s30   ;;  %s2772_s29 = sphi %s2880_s29, %s3959_s29   ;;  %s2768_s28 = sphi %s2878_s28, %s3958_s28   ;;  %s2764_s27 = sphi %s2876_s27, %s3957_s27   ;;  %s2760_s26 = sphi %s2874_s26, %s3956_s26   ;;  %s2756_s25 = sphi %s2872_s25, %s3955_s25  }
   0xe   : > { %s2126_s16 = sadd.s32 4294967294, %s2792_s14   ;;  %s37_s17 = sadd.s32 1, %s2784_s13 }
   0xf   : > { %s40_s18 = sadd.s32 1, %s2788_s11  ;;  %p38_p0 = scmp.ge.s32.totalorder %s37_s17, 2 }
  0x10   : > { %s49_s19 = sadd.s32 1, %s2772_s29  ;;  %p56_p1 = scmp.ne.s32.totalorder %s2772_s29, %s2768_s28 }
  0x11   : > { %p57_p2 = scmp.eq.s32.totalorder %s2792_s14, 0  ;;  %s3965_s17 = smov (%p38_p0, %s37_s17), 0 }
  0x12   : > { %3878 = sst [smem:[#allocation15_spill]] %s3965_s17  ;;  %s3967_s18 = smov (!%p38_p0, %s40_s18), %s2788_s11 }
  0x13   : > { %s44_s20 = ssub.s32 %s2784_s13, %s3965_s17  ;;  %p2935_p3 = por %p57_p2, %p56_p1 }
  0x14   : > { %p42_p4 = scmp.ge.s32.totalorder %s3967_s18, 2  ;;  %s311_s22 = sadd.s32 1, %s2764_s27 }
  0x15   : > { %p321_p5 = scmp.ne.s32.totalorder %s2764_s27, %s2760_s26  ;;  %p322_p6 = scmp.eq.s32.totalorder %s2125_s15, 3 }
  0x16   : > { %s3969_s18 = smov (%p42_p4, %s3967_s18), 0  ;;  %p327_p8 = scmp.ne.s32.totalorder %s2760_s26, %s2756_s25 }
  0x17   : > { %3880 = sst [smem:[#allocation16_spill]] %s3969_s18  ;;  %p2944_p7 = por %p322_p6, %p321_p5 }
  0x18   : > { %s45_s24 = ssub.s32 %s2788_s11, %s3969_s18  ;;  %p328_p9 = scmp.eq.s32.totalorder %s2126_s16, 3 }
  0x19   : > { %s46_s17 = sor.u32 %s45_s24, %s44_s20  ;;  %p309_p10 = scmp.eq.s32.totalorder %s45_s24, 0 }
  0x1a   : > { %p47_p11 = scmp.eq.s32.totalorder %s46_s17, 0  ;;  %p2952_p12 = por %p328_p9, %p327_p8 }
  0x1b   : > { %s2957_s10 = scalar_select %p309_p10, %s2764_s27, %s311_s22  }
  0x1c   : > { %s3882_s12 = scalar_select %p2952_p12, 1, 0 }
  0x1d   : > { %s2960_s15 = scalar_select %p47_p11, %s2772_s29, %s49_s19  }
  0x1e   : > { %3883 = sst [smem:[#allocation17_spill]] %s3882_s12  ;;  %p2128_p13 = scmp.ge.s32.totalorder %s2792_s14, 4 }
  0x20   : > { %374 = sbr.rel (%p2128_p13) target bundleno = 51 (0x33), region = 56 }
  0x27   : > { %377 = sbr.rel (!%p2935_p3) target bundleno = 51 (0x33), region = 60  ;;  %s379_s16 = sand.u32 (%p2935_p3), 1, %s2772_s29  }
  0x28   : > { %s2230_s20 = sshll.u32 (%p2935_p3), %s2784_s13, 3  ;;  %s2129_s17 = sshll.u32 (%p2935_p3), %s379_s16, 4 }
  0x29   : > { %s384_s24 = sadd.s32 (%p2935_p3), %s2788_s11, %s2230_s20  ;;  %s3884_s0 = sld [smem:[#allocation40_spill]] (%p2935_p3) }
  0x2a   : > { %s2132_s18 = sshll.u32 (%p2935_p3), %s384_s24, 2  ;;  %s381_s19 = scalar_lea.vmem (%p2935_p3), [#allocation10], %s2129_s17 }
  0x2f   : > { %s386_s22 = scalar_lea.vmem %s3884_s0, %s2132_s18 }
  0x30   : > { %v402_v1 = vld [vmem:[%s386_s22] sm:$0xf]  ;;  %v404_v2 = vld [vmem:[%s386_s22 + $0x8] sm:$0xf]  ;;  %v406_v3 = vld [vmem:[%s386_s22 + $0x10] sm:$0xf] }
  0x31   : > { %403 = vst [vmem:[%s381_s19] sm:$0xf] %v402_v1  ;;  %405 = vst [vmem:[%s381_s19 + $0x4] sm:$0xf] %v404_v2  ;;  %v408_v4 = vld [vmem:[%s386_s22 + $0x18] sm:$0xf] }
  0x32   : > { %407 = vst [vmem:[%s381_s19 + $0x8] sm:$0xf] %v406_v3  ;;  %409 = vst [vmem:[%s381_s19 + $0xc] sm:$0xf] %v408_v4 }
  0x33 PF: > { %p2133_p0 = scmp.ge.s32.totalorder %s2792_s14, 1  ;;  %p446_p1 = scmp.lt.s32.totalorder %s2792_s14, 5 }
  0x35   : > { %p447_p2 = pnand %p2133_p0, %p446_p1 }
  0x37   : > { %450 = sbr.rel (%p447_p2) target bundleno = 2678 (0xa76), region = 105 }
  0x3e   : > { %s453_s12 = sand.u32 1, %s2768_s28   ;;  %s3838_s25 = sand.u32 1, %s2760_s26  }
  0x3f   : > { %s2975_s18 = sshll.u32 %s453_s12, 4  ;;  %s2979_s21 = sshll.u32 %s3838_s25, 3 }
  0x40   : > { %p499_p3 = scmp.lt.s32.totalorder %s2780_s2, 1  ;;  %s2983_s16 = sshll.u32 %s2776_s30, 2 }
  0x41   : > { %s3885_s1 = sld [smem:[#allocation41_spill]]  ;;  %p2138_p4 = scmp.ne.s32.totalorder %s2776_s30, 0 }
  0x42   : > { %s500_s20 = scalar_select %p499_p3, %s2780_s2, 1 }
  0x43   : > { %508 = sbr.rel (%p2138_p4) target bundleno = 74 (0x4a), region = 113  ;;  %vm511_vm0 = vcmask (!%p2138_p4), 7168   ;;  %v2794_v5 = vmov (!%p2138_p4), 0.0   ;;  %v2795_v6 = vmov (!%p2138_p4), -1e+30  }
  0x44   : > { %s2136_s17 = sshll.u32 %s500_s20, 3  ;;  %509 = vst [vmem:[#allocation3] sm:$0xff] (!%p2138_p4), %v2794_v5  ;;  %510 = vst [vmem:[#allocation4] sm:$0xff] (!%p2138_p4), %v2794_v5 }
  0x45   : > { %514 = vst [vmem:[#allocation7] sm:$0xff] (!%p2138_p4), %v2794_v5  ;;  %512 = vst.msk [vmem:[#allocation5] sm:$0xff] (!%p2138_p4), %vm511_vm0, %v2795_v6 }
  0x46   : > { %513 = vst.msk [vmem:[#allocation6] sm:$0xff] (!%p2138_p4), %vm511_vm0, %v2794_v5 }
  0x47   : > { %s2989_s19 = scalar_lea.vmem %s3885_s1, %s2136_s17 }
  0x4a PF: > { %s3886_s3 = sld [smem:[#allocation42_spill]]  ;;  %v3839_v9 = vmov 0   ;;  %s3887_s12 = scalar_lea.vmem [#allocation10], %s2975_s18  ;;  %vm575_vm1 = vcmask 130048   ;;  %v3015_v13 = vld [vmem:[%s3824_s4 + $0x4] ss:$16 sps:$4 sm:$0xff]   ;;  %v1046_v36 = vstv %s2983_s16  ;;  %v525_v63 = vlaneseq }
  0x4b   : > { %614 = vmatprep.mubr.bf16.mxu0 %v3839_v9  ;;  %667 = vmatprep.mubr.bf16.mxu1 %v3839_v9  ;;  %v2516_v12 = vld [vmem:[%s3887_s12] sm:$0xff]   ;;  %v3038_v17 = vld [vmem:[%s3824_s4 + $0x24] ss:$16 sps:$4 sm:$0xff]   ;;  %s3889_s0 = scalar_lea.vmem [#allocation10], %s2975_s18  ;;  %s3871_s25 = sadd.s32 1, %s2983_s16  ;;  %v3843_v54 = vmov 0.0  }
  0x4c   : > { %2508 = vset.pattern.permute.xlu0 %v3839_v9  ;;  %2509 = vset.pattern.permute.xlu1 %v3839_v9  ;;  %v3020_v14 = vld [vmem:[%s3824_s4 + $0xc] ss:$16 sps:$4 sm:$0xff]   ;;  %v3025_v15 = vld [vmem:[%s3824_s4] ss:$16 sps:$4 sm:$0xff]   ;;  %v3031_v16 = vld [vmem:[%s3824_s4 + $0x8] ss:$16 sps:$4 sm:$0xff]   ;;  %v1388_v38 = vstv %s3871_s25 }
  0x4d   : > { %3888 = vst [vmem:[#allocation18_spill] sm:$0xff] %v3020_v14  ;;  %v3045_v18 = vld [vmem:[%s3824_s4 + $0x2c] ss:$16 sps:$4 sm:$0xff]   ;;  %v3050_v19 = vld [vmem:[%s3824_s4 + $0x20] ss:$16 sps:$4 sm:$0xff]   ;;  %vm2798_vm4 = vmmov 0  }
  0x4e   : > { %v3055_v20 = vld [vmem:[%s3824_s4 + $0x28] ss:$16 sps:$4 sm:$0xff]   ;;  %v3062_v21 = vld [vmem:[%s3824_s4 + $0x44] ss:$16 sps:$4 sm:$0xff]   ;;  %v3068_v22 = vld [vmem:[%s3824_s4 + $0x4c] ss:$16 sps:$4 sm:$0xff]  }
  0x4f   : > { %v3076_v23 = vld [vmem:[%s3824_s4 + $0x40] ss:$16 sps:$4 sm:$0xff]   ;;  %v3083_v24 = vld [vmem:[%s3824_s4 + $0x48] ss:$16 sps:$4 sm:$0xff]   ;;  %v3088_v25 = vld [vmem:[%s3824_s4 + $0x64] ss:$16 sps:$4 sm:$0xff]  }
  0x50   : > { %v2510_v7 = vld [vmem:[%s3886_s3 + $0x4] ss:$16 sps:$4 sm:$0xff]   ;;  %v2512_v8 = vld [vmem:[%s3886_s3 + $0xc] ss:$16 sps:$4 sm:$0xff]   ;;  %v2514_v10 = vld [vmem:[%s3886_s3] ss:$16 sps:$4 sm:$0xff]  }
  0x51   : > { %582 = vmatprep.subr.bf16.mxu0 %v2510_v7  ;;  %v2515_v11 = vld [vmem:[%s3886_s3 + $0x8] ss:$16 sps:$4 sm:$0xff]   ;;  %635 = vmatprep.subr.bf16.mxu1 %v2512_v8  ;;  %v3094_v26 = vld [vmem:[%s3824_s4 + $0x6c] ss:$16 sps:$4 sm:$0xff]   ;;  %v3100_v27 = vld [vmem:[%s3824_s4 + $0x60] ss:$16 sps:$4 sm:$0xff]  }
  0x52   : > { %583 = vmatpush1.bf16.msra.mxu0 %v2514_v10  ;;  %636 = vmatpush1.bf16.msra.mxu1 %v2515_v11  ;;  %v3105_v28 = vld [vmem:[%s3824_s4 + $0x68] ss:$16 sps:$4 sm:$0xff]   ;;  %v3112_v29 = vld [vmem:[%s3824_s4 + $0x84] ss:$16 sps:$4 sm:$0xff]   ;;  %v3118_v30 = vld [vmem:[%s3824_s4 + $0x8c] ss:$16 sps:$4 sm:$0xff]  }
  0x53   : > { %936 = vmatprep.subr.bf16.mxu0 %v3015_v13  ;;  %977 = vmatprep.subr.bf16.mxu1 %v3020_v14  ;;  %v2551_v31 = vld [vmem:[%s3889_s0 + $0x8] sm:$0xff]   ;;  %v3145_v35 = vld [vmem:[%s3824_s4 + $0xac] ss:$16 sps:$4 sm:$0xff]   ;;  %v526_v1 = vshrl.u32 %v525_v63, 7  ;;  %vm1181_vm7 = vcmask 523264   ;;  %vm1233_vm8 = vcmask 261120  }
  0x54   : > { %v3126_v32 = vld [vmem:[%s3824_s4 + $0x80] ss:$16 sps:$4 sm:$0xff]   ;;  %v3131_v33 = vld [vmem:[%s3824_s4 + $0x88] ss:$16 sps:$4 sm:$0xff]   ;;  %v3138_v34 = vld [vmem:[%s3824_s4 + $0xa4] ss:$16 sps:$4 sm:$0xff]  }
  0x55   : > { %2145 = vmatmul.mubr.msk.bf16.vlgmr.msra.gmra.mrb[0].mxu0 %vm575_vm1, %v2516_v12  ;;  %2147 = vmatmul.mubr.msk.bf16.vlgmr.msra.gmra.mrb[0].mxu1 %vm575_vm1, %v2516_v12  ;;  %v3155_v37 = vld [vmem:[%s3824_s4 + $0xa0] ss:$16 sps:$4 sm:$0xff]   ;;  %v3165_v39 = vld [vmem:[%s3824_s4 + $0xa8] ss:$16 sps:$4 sm:$0xff]   ;;  %v3170_v40 = vld [vmem:[%s3824_s4 + $0xc4] ss:$16 sps:$4 sm:$0xff]  }
  0x56   : > { %937 = vmatpush1.bf16.msra.mxu0 %v3025_v15  ;;  %978 = vmatpush1.bf16.msra.mxu1 %v3031_v16  ;;  %v3176_v41 = vld [vmem:[%s3824_s4 + $0xcc] ss:$16 sps:$4 sm:$0xff]   ;;  %v3181_v42 = vld [vmem:[%s3824_s4 + $0xc0] ss:$16 sps:$4 sm:$0xff]   ;;  %v3189_v44 = vld [vmem:[%s3824_s4 + $0xc8] ss:$16 sps:$4 sm:$0xff]  }
  0x57   : > { %938 = vmatprep.subr.bf16.mxu0 %v3038_v17  ;;  %979 = vmatprep.subr.bf16.mxu1 %v3045_v18  ;;  %v3184_v43 = vld [vmem:[%s2989_s19] sm:$0xff]  ;;  %v3202_v46 = vld [vmem:[%s3824_s4 + $0xec] ss:$16 sps:$4 sm:$0xff]   ;;  %v3217_v51 = vld [vmem:[%s3824_s4 + $0xe8] ss:$16 sps:$4 sm:$0xff]   ;;  %v527_v3 = vsub.s32 0, %v526_v1 }
  0x58   : > { %624 = vmatprep.mubr.bf16.mxu0 %v3839_v9  ;;  %677 = vmatprep.mubr.bf16.mxu1 %v3839_v9  ;;  %3890 = vst [vmem:[#allocation19_spill] sm:$0xff] %v3184_v43  ;;  %v3194_v45 = vld [vmem:[%s3824_s4 + $0xe4] ss:$16 sps:$4 sm:$0xff]   ;;  %vm1047_vm2 = vcmp.lt.s32.totalorder %v1046_v36, %v3184_v43  ;;  %vm1389_vm3 = vcmp.lt.s32.totalorder %v1388_v38, %v3184_v43  ;;  %v3212_v49 = vld [vmem:[%s3824_s4 + $0xe0] ss:$16 sps:$4 sm:$0xff]   ;;  %v3237_v55 = vld [vmem:[%s3826_s6 + $0x8] sm:$0xff]  }
  0x59   : > { %v1048_v47 = vsel %vm1047_vm2, 1, %v3839_v9  ;;  %v1390_v48 = vsel %vm1389_vm3, 1, %v3839_v9  ;;  %v766_v50 = vld [vmem:[#allocation3] sm:$0xff]  ;;  %3892 = vst [vmem:[#allocation21_spill] sm:$0xff] %v3237_v55  ;;  %v3244_v56 = vld [vmem:[%s3826_s6 + $0x10] sm:$0xff]   ;;  %v3251_v57 = vld [vmem:[%s3826_s6 + $0x18] sm:$0xff]  }
  0x5a   : > { %939 = vmatpush1.bf16.msra.mxu0 %v3050_v19  ;;  %980 = vmatpush1.bf16.msra.mxu1 %v3055_v20  ;;  %v775_v52 = vpack.c.bf16 %v766_v50, %v766_v50  ;;  %v3228_v53 = vld [vmem:[%s3826_s6] sm:$0xff]   ;;  %3893 = vst [vmem:[#allocation22_spill] sm:$0xff] %v3244_v56  ;;  %3894 = vst [vmem:[#allocation23_spill] sm:$0xff] %v3251_v57  ;;  %v3264_v59 = vld [vmem:[%s3826_s6 + $0x28] sm:$0xff]   ;;  %v535_v5 = vsub.s32 2, %v526_v1  ;;  %v539_v6 = vsub.s32 3, %v526_v1 }
  0x5b   : > { %940 = vmatprep.subr.bf16.mxu0 %v3062_v21  ;;  %981 = vmatprep.subr.bf16.mxu1 %v3068_v22  ;;  %3891 = vst [vmem:[#allocation20_spill] sm:$0xff] %v3228_v53  ;;  %v3258_v58 = vld [vmem:[%s3826_s6 + $0x20] sm:$0xff]   ;;  %3896 = vst [vmem:[#allocation25_spill] sm:$0xff] %v3264_v59  ;;  %v3275_v60 = vld [vmem:[%s3826_s6 + $0x30] sm:$0xff]   ;;  %v531_v7 = vsub.s32 1, %v526_v1  ;;  %s3923_s19 = sld [smem:[#allocation43_spill]] }
  0x5c   : > { %1050 = vperm.xlu0 %2508, %v1048_v47   ;;  %3895 = vst [vmem:[#allocation24_spill] sm:$0xff] %v3258_v58  ;;  %3897 = vst [vmem:[#allocation26_spill] sm:$0xff] %v3275_v60  ;;  %v3282_v61 = vld [vmem:[%s3826_s6 + $0x38] sm:$0xff]   ;;  %v3290_v62 = vld [vmem:[%s3828_s8] sm:$0xff]   ;;  %s3870_s28 = sadd.s32 2, %s2983_s16  ;;  %s3869_s22 = sadd.s32 3, %s2983_s16 }
  0x5d   : > { %2146 = vmatmul.mubr.msk.bf16.gmra.mrb[4].mxu0 %vm575_vm1, %v2551_v31  ;;  %2148 = vmatmul.mubr.msk.bf16.gmra.mrb[4].mxu1 %vm575_vm1, %v2551_v31  ;;  %3898 = vst [vmem:[#allocation27_spill] sm:$0xff] %v3282_v61  ;;  %v3296_v0 = vld [vmem:[%s3828_s8 + $0x8] sm:$0xff]   ;;  %v3303_v2 = vld [vmem:[%s3828_s8 + $0x10] sm:$0xff]   ;;  %v523_v4 = vld [vmem:[%s3825_s5] sm:$0xf]  ;;  %s3543_s12 = sld [smem:[#allocation8]] }
  0x5e   : > { %941 = vmatpush1.bf16.msra.mxu0 %v3076_v23  ;;  %982 = vmatpush1.bf16.msra.mxu1 %v3083_v24  ;;  %v528_v8 = vrot.slane %v523_v4, %v527_v3  ;;  %v536_v11 = vrot.slane %v523_v4, %v535_v5  ;;  %v540_v36 = vrot.slane %v523_v4, %v539_v6  ;;  %s3937_s1 = sadd.s32 1, %s2983_s16  ;;  %s3943_s24 = sadd.s32 3, %s2983_s16 }
  0x5f   : > { %942 = vmatprep.subr.bf16.mxu0 %v3088_v25  ;;  %983 = vmatprep.subr.bf16.mxu1 %v3094_v26  ;;  %v532_v38 = vrot.slane %v523_v4, %v531_v7  ;;  %p2225_p10 = scmp.ne.s32.totalorder %s2776_s30, 1 }
  0x60   : > { %968 = vmatprep.mubr.bf16.mxu0 %v3839_v9  ;;  %1009 = vmatprep.mubr.bf16.mxu1 %v3839_v9 }
  0x61   : > { %1392 = vperm.xlu0 %2508, %v1390_v48  }
  0x62   : > { %943 = vmatpush1.bf16.msra.mxu0 %v3100_v27  ;;  %984 = vmatpush1.bf16.msra.mxu1 %v3105_v28 }
  0x63   : > { %944 = vmatprep.subr.bf16.mxu0 %v3112_v29  ;;  %985 = vmatprep.subr.bf16.mxu1 %v3118_v30  ;;  %p1244_p5 = scmp.lt.s32.totalorder %s2983_s16, %s3543_s12  ;;  %p1488_p6 = scmp.lt.s32.totalorder %s3937_s1, %s3543_s12 }
  0x64   : > { %p1976_p9 = scmp.lt.s32.totalorder %s3943_s24, %s3543_s12 }
  0x65   : > { %s1245_s20 = scalar_select %p1244_p5, 1, 0 }
  0x66   : > { %945 = vmatpush1.bf16.msra.mxu0 %v3126_v32  ;;  %986 = vmatpush1.bf16.msra.mxu1 %v3131_v33  ;;  %s1489_s25 = scalar_select %p1488_p6, 1, 0 }
  0x67   : > { %946 = vmatprep.subr.bf16.mxu0 %v3138_v34  ;;  %987 = vmatprep.subr.bf16.mxu1 %v3145_v35  ;;  %s1977_s0 = scalar_select %p1976_p9, 1, 0 }
  0x6a   : > { %947 = vmatpush1.bf16.msra.mxu0 %v3155_v37  ;;  %988 = vmatpush1.bf16.msra.mxu1 %v3165_v39 }
  0x6b   : > { %948 = vmatprep.subr.bf16.mxu0 %v3170_v40  ;;  %989 = vmatprep.subr.bf16.mxu1 %v3176_v41 }
  0x6e   : > { %949 = vmatpush1.bf16.msra.mxu0 %v3181_v42  ;;  %990 = vmatpush1.bf16.msra.mxu1 %v3189_v44 }
  0x6f   : > { %950 = vmatprep.subr.bf16.mxu0 %v3194_v45  ;;  %991 = vmatprep.subr.bf16.mxu1 %v3202_v46 }
  0x72   : > { %951 = vmatpush1.bf16.msra.mxu0 %v3212_v49  ;;  %992 = vmatpush1.bf16.msra.mxu1 %v3217_v51 }
  0x73   : > { %2287 = vmatprep.subr.bf16.mxu0 %v3843_v54  ;;  %2307 = vmatprep.subr.bf16.mxu1 %v3843_v54 }
  0x75   : > { %969 = vmatmul.mubr.bf16.vlgmr.msra.gmra.mrb[8].mxu0 %v775_v52  ;;  %1010 = vmatmul.mubr.bf16.vlgmr.msra.gmra.mrb[8].mxu1 %v775_v52 }
  0x76   : > { %2288 = vmatpush3.bf16.msra.mxu0 %v3228_v53  ;;  %2303 = vmatprep.mubr.msk.bf16.mxu0 %vm2798_vm4, %v3843_v54 }
  0x77   : > { %2289 = vmatprep.subr.bf16.mxu0 %v3843_v54  ;;  %2315 = vmatprep.mubr.msk.bf16.mxu1 %vm2798_vm4, %v3843_v54 }
  0x78   : > { %2308 = vmatpush3.bf16.msra.mxu1 %v3290_v62 }
  0x79   : > { %2309 = vmatprep.subr.bf16.mxu1 %v3843_v54 }
  0x7a   : > { %2290 = vmatpush3.bf16.msra.mxu0 %v3237_v55 }
  0x7b   : > { %2291 = vmatprep.subr.bf16.mxu0 %v3843_v54 }
  0x7c   : > { %2310 = vmatpush3.bf16.msra.mxu1 %v3296_v0 }
  0x7d   : > { %2311 = vmatprep.subr.bf16.mxu1 %v3843_v54 }
  0x7e   : > { %2292 = vmatpush3.bf16.msra.mxu0 %v3244_v56 }
  0x7f   : > { %2293 = vmatprep.subr.bf16.mxu0 %v3843_v54 }
  0x80   : > { %2312 = vmatpush3.bf16.msra.mxu1 %v3303_v2 }
  0x81   : > { %2313 = vmatprep.subr.bf16.mxu1 %v3843_v54 }
  0x82   : > { %2294 = vmatpush3.bf16.msra.mxu0 %v3251_v57 }
  0x83   : > { %2295 = vmatprep.subr.bf16.mxu0 %v3843_v54 }
  0x86   : > { %2296 = vmatpush3.bf16.msra.mxu0 %v3258_v58 }
  0x87   : > { %2297 = vmatprep.subr.bf16.mxu0 %v3843_v54 }
  0x8a   : > { %2298 = vmatpush3.bf16.msra.mxu0 %v3264_v59 }
  0x8b   : > { %2299 = vmatprep.subr.bf16.mxu0 %v3843_v54 }
  0x8e   : > { %2300 = vmatpush3.bf16.msra.mxu0 %v3275_v60 }
  0x8f   : > { %2301 = vmatprep.subr.bf16.mxu0 %v3843_v54 }
  0x92   : > { %2302 = vmatpush3.bf16.msra.mxu0 %v3282_v61 }
  0x93   : > { %1319 = vmatprep.subr.bf16.mxu0 %v3020_v14 }
 0x128   : > { %v616_v10 = vpop.f32.mrb[0].mxu0  ;;  %v669_v31 = vpop.f32.mrb[0].mxu1 }
 0x129   : > { %v618_v12 = vpop.f32.mrb[1].mxu0  ;;  %v671_v48 = vpop.f32.mrb[1].mxu1  ;;  %v617_v59 = vadd.f32 %v616_v10, %v528_v8 }
 0x12a   : > { %v620_v47 = vpop.f32.mrb[2].mxu0  ;;  %v673_v63 = vpop.f32.mrb[2].mxu1 }
 0x12b   : > { %v3311_v50 = vadd.f32 %v620_v47, %v528_v8  ;;  %v622_v52 = vpop.f32.mrb[3].mxu0  ;;  %v3315_v43 = vadd.f32 %v673_v63, %v536_v11  ;;  %v675_v54 = vpop.f32.mrb[3].mxu1 }
 0x12c   : > { %v3313_v9 = vadd.f32 %v622_v52, %v532_v38  ;;  %v3317_v14 = vadd.f32 %v675_v54, %v540_v36 }
 0x12d   : > { %3899 = vst [vmem:[#allocation28_spill] sm:$0xff] %v3311_v50 }
 0x12e   : > { %3900 = vst [vmem:[#allocation29_spill] sm:$0xff] %v3313_v9 }
 0x130   : > { %v626_v1 = vpop.f32.mrb[4].mxu0  ;;  %v679_v61 = vpop.f32.mrb[4].mxu1 }
 0x131   : > { %v3319_v3 = vadd.f32 %v626_v1, %v528_v8  ;;  %v628_v5 = vpop.f32.mrb[5].mxu0  ;;  %v3323_v7 = vadd.f32 %v679_v61, %v536_v11  ;;  %v681_v47 = vpop.f32.mrb[5].mxu1  ;;  %v672_v61 = vadd.f32 %v671_v48, %v540_v36 }
 0x132   : > { %v3321_v6 = vadd.f32 %v628_v5, %v532_v38  ;;  %v630_v4 = vpop.f32.mrb[6].mxu0  ;;  %v3327_v9 = vadd.f32 %v681_v47, %v540_v36  ;;  %v683_v63 = vpop.f32.mrb[6].mxu1  ;;  %v619_v5 = vadd.f32 %v618_v12, %v532_v38 }
 0x133   : > { %3901 = vst [vmem:[#allocation30_spill] sm:$0xff] %v3319_v3  ;;  %3903 = vst [vmem:[#allocation32_spill] sm:$0xff] %v3323_v7  ;;  %v3325_v50 = vadd.f32 %v630_v4, %v528_v8  ;;  %v632_v52 = vpop.f32.mrb[7].mxu0  ;;  %v3331_v54 = vadd.f32 %v683_v63, %v536_v11  ;;  %v685_v1 = vpop.f32.mrb[7].mxu1 }
 0x134   : > { %3902 = vst [vmem:[#allocation31_spill] sm:$0xff] %v3321_v6  ;;  %3905 = vst [vmem:[#allocation34_spill] sm:$0xff] %v3327_v9  ;;  %v3329_v60 = vadd.f32 %v632_v52, %v532_v38  ;;  %v3333_v3 = vadd.f32 %v685_v1, %v540_v36  ;;  %v670_v6 = vadd.f32 %v669_v31, %v536_v11  ;;  %v3912_v1 = vmov 0.0  }
 0x135   : > { %3904 = vst [vmem:[#allocation33_spill] sm:$0xff] %v3325_v50  ;;  %3907 = vst [vmem:[#allocation36_spill] sm:$0xff] %v3331_v54 }
 0x136   : > { %3906 = vst [vmem:[#allocation35_spill] sm:$0xff] %v3329_v60  ;;  %3908 = vst [vmem:[#allocation37_spill] sm:$0xff] %v3333_v3 }
 0x148   : > { %v970_v58 = vpop.f32.mrb[8].mxu0  ;;  %v1011_v57 = vpop.f32.mrb[8].mxu1 }
 0x149   : > { %v1018_v7 = vadd.f32 %v970_v58, %v617_v59  ;;  %v972_v4 = vpop.f32.mrb[9].mxu0  ;;  %v1020_v50 = vadd.f32 %v1011_v57, %v670_v6  ;;  %v1013_v47 = vpop.f32.mrb[9].mxu1 }
 0x14a   : > { %v1019_v56 = vadd.f32 %v972_v4, %v619_v5  ;;  %v974_v9 = vpop.f32.mrb[10].mxu0  ;;  %v1021_v52 = vadd.f32 %v1013_v47, %v672_v61  ;;  %v1015_v63 = vpop.f32.mrb[10].mxu1  ;;  %v3380_v5 = vld [vmem:[%s3828_s8 + $0x18] sm:$0xff]   ;;  %v3389_v61 = vld [vmem:[%s3827_s7] ss:$0 sm:$0xff] }
 0x14b   : > { %v2181_v55 = vmul.f32 -1.442695, %v1018_v7  ;;  %v975_v60 = vpop.f32.mrb[11].mxu0  ;;  %v1016_v53 = vpop.f32.mrb[11].mxu1  ;;  %v767_v9 = vld [vmem:[#allocation4] sm:$0xff]  ;;  %2314 = vmatpush3.bf16.msra.mxu1 %v3380_v5 }
 0x14c   : > { %v2182_v54 = vmul.f32 -1.442695, %v1019_v56  ;;  %v2183_v8 = vmul.f32 -1.442695, %v1021_v52  ;;  %1278 = vmatprep.subr.bf16.mxu1 %v3015_v13 }
 0x14d   : > { %2578 = vpow2.f32 %v2181_v55  ;;  %v3338_v55 = vpop.permute.xlu0 %1050 }
 0x14e   : > { %2580 = vpow2.f32 %v2182_v54  ;;  %3909 = vst [vmem:[#allocation38_spill] sm:$0xff] %v3338_v55  ;;  %vm1052_vm5 = vcmp.eq.s32.totalorder %v3338_v55, 1  ;;  %v3911_v54 = vmov 0   ;;  %v3925_v55 = vld [vmem:[#allocation28_spill] sm:$0xff] }
 0x14f   : > { %2582 = vpow2.f32 %v2183_v8  ;;  %vm2193_vm6 = vmpackc.low %vm1052_vm5, %vm1052_vm5 }
 0x150   : > { %2584 = vtanh.f32 %v1020_v50 }
 0x157   : > { %v2579_v10 = vpop.eup %2578 }
 0x158   : > { %v2581_v11 = vpop.eup %2580  ;;  %v1025_v12 = vadd.f32 1.0, %v2579_v10 }
 0x159   : > { %v1031_v58 = vadd.f32 1.0, %v2581_v11  ;;  %v2583_v57 = vpop.eup %2582 }
 0x15a   : > { %2586 = vrcp.f32 %v1025_v12  ;;  %v2585_v59 = vpop.eup %2584  ;;  %v1038_v38 = vadd.f32 1.0, %v2583_v57 }
 0x15b   : > { %2588 = vrcp.f32 %v1031_v58 }
 0x15c   : > { %2590 = vrcp.f32 %v1038_v38  ;;  %v3917_v38 = vld [vmem:[#allocation24_spill] sm:$0xff] }
 0x164   : > { %v2587_v31 = vpop.eup %2586 }
 0x165   : > { %v2589_v36 = vpop.eup %2588  ;;  %v1042_v60 = vmul.f32 %v2587_v31, %v2585_v59 }
 0x166   : > { %v1041_v56 = vmul.f32 %v2589_v36, %v767_v9  ;;  %v2591_v48 = vpop.eup %2590  ;;  %v3913_v36 = vld [vmem:[#allocation20_spill] sm:$0xff] }
 0x168   : > { %v3335_v53 = vadd.f32 %v1042_v60, %v1041_v56  ;;  %v3916_v60 = vld [vmem:[#allocation23_spill] sm:$0xff]  ;;  %v3918_v56 = vld [vmem:[#allocation25_spill] sm:$0xff] }
 0x16a   : > { %2592 = vtanh.f32 %v3335_v53 }
 0x174   : > { %v2593_v50 = vpop.eup %2592 }
 0x175   : > { %v3341_v6 = vmul.f32 %v2593_v50, %v2591_v48  ;;  %v3919_v48 = vld [vmem:[#allocation26_spill] sm:$0xff]  ;;  %v3920_v50 = vld [vmem:[#allocation27_spill] sm:$0xff] }
 0x177   : > { %3910 = vst [vmem:[#allocation39_spill] sm:$0xff] %v3341_v6  ;;  %v3348_v7 = vpack.c.bf16 %v3341_v6, %v3341_v6 }
 0x179   : > { %2304 = vmatmul.mubr.msk.bf16.vlgmr.msra.gmra.mrb[12].mxu0 %vm2193_vm6, %v3348_v7  ;;  %vm2005_vm6 = vcmask 7168  }
 0x17a   : > { %1320 = vmatpush1.bf16.msra.mxu0 %v3031_v16  ;;  %1351 = vmatprep.mubr.bf16.mxu0 %v3911_v54 }
 0x17b   : > { %1321 = vmatprep.subr.bf16.mxu0 %v3045_v18 }
 0x17e   : > { %1322 = vmatpush1.bf16.msra.mxu0 %v3055_v20 }
 0x17f   : > { %1323 = vmatprep.subr.bf16.mxu0 %v3068_v22 }
 0x182   : > { %1324 = vmatpush1.bf16.msra.mxu0 %v3083_v24 }
 0x183   : > { %1325 = vmatprep.subr.bf16.mxu0 %v3094_v26 }
 0x186   : > { %1326 = vmatpush1.bf16.msra.mxu0 %v3105_v28 }
 0x187   : > { %1327 = vmatprep.subr.bf16.mxu0 %v3118_v30 }
 0x18a   : > { %1328 = vmatpush1.bf16.msra.mxu0 %v3131_v33 }
 0x18b   : > { %1329 = vmatprep.subr.bf16.mxu0 %v3145_v35 }
 0x18e   : > { %1330 = vmatpush1.bf16.msra.mxu0 %v3165_v39 }
 0x18f   : > { %1331 = vmatprep.subr.bf16.mxu0 %v3176_v41 }
 0x192   : > { %1332 = vmatpush1.bf16.msra.mxu0 %v3189_v44 }
 0x193   : > { %1333 = vmatprep.subr.bf16.mxu0 %v3202_v46 }
 0x196   : > { %1334 = vmatpush1.bf16.msra.mxu0 %v3217_v51 }
 0x197   : > { %2339 = vmatprep.subr.bf16.mxu0 %v3912_v1 }
 0x199   : > { %1352 = vmatmul.mubr.bf16.vlgmr.msra.gmra.mrb[16].mxu0 %v3348_v7 }
 0x19a   : > { %2340 = vmatpush3.bf16.msra.mxu0 %v3290_v62  ;;  %2347 = vmatprep.mubr.msk.bf16.mxu0 %vm2798_vm4, %v3912_v1 }
 0x19b   : > { %2341 = vmatprep.subr.bf16.mxu0 %v3912_v1 }
 0x19e   : > { %2342 = vmatpush3.bf16.msra.mxu0 %v3296_v0 }
 0x19f   : > { %2343 = vmatprep.subr.bf16.mxu0 %v3912_v1 }
 0x1a2   : > { %2344 = vmatpush3.bf16.msra.mxu0 %v3303_v2 }
 0x1a3   : > { %2345 = vmatprep.subr.bf16.mxu0 %v3912_v1 }
 0x1a6   : > { %2346 = vmatpush3.bf16.msra.mxu0 %v3380_v5 }
 0x1a7   : > { %1522 = vmatprep.subr.bf16.mxu0 %v3015_v13 }
 0x24c   : > { %v1143_v4 = vpop.f32.mrb[12].mxu0 }
 0x24d   : > { %v1144_v47 = vadd.f32 %v3389_v61, %v1143_v4  ;;  %v2305_v52 = vpop.f32.mrb[13].mxu0  ;;  %v3434_v4 = vld [vmem:[%s3829_s9] ss:$0 sm:$0xff] }
 0x24e   : > { %v1146_v63 = vpop.f32.mrb[14].mxu0  ;;  %3922 = vst [vmem:[#allocation20_spill] sm:$0xff] %v3434_v4 }
 0x24f   : > { %v1149_v8 = vmax.f32 %v1144_v47, 0.0  ;;  %v2306_v10 = vpop.f32.mrb[15].mxu0 }
 0x250   : > { %v3440_v10 = vld [vmem:[%s3923_s19] ss:$0 sm:$0xff] }
 0x251   : > { %v1150_v11 = vpack.c.bf16 %v1149_v8, %v1149_v8 }
 0x253   : > { %2316 = vmatmul.mubr.msk.bf16.vlgmr.msra.gmra.mrb[12].mxu1 %vm1181_vm7, %v1150_v11 }
 0x254   : > { %1279 = vmatpush1.bf16.msra.mxu1 %v3025_v15  ;;  %1310 = vmatprep.mubr.bf16.mxu1 %v3911_v54 }
 0x255   : > { %1280 = vmatprep.subr.bf16.mxu1 %v3038_v17 }
 0x258   : > { %1281 = vmatpush1.bf16.msra.mxu1 %v3050_v19 }
 0x259   : > { %1282 = vmatprep.subr.bf16.mxu1 %v3062_v21 }
 0x25c   : > { %1283 = vmatpush1.bf16.msra.mxu1 %v3076_v23 }
 0x25d   : > { %1284 = vmatprep.subr.bf16.mxu1 %v3088_v25 }
 0x260   : > { %1285 = vmatpush1.bf16.msra.mxu1 %v3100_v27 }
 0x261   : > { %1286 = vmatprep.subr.bf16.mxu1 %v3112_v29 }
 0x264   : > { %1287 = vmatpush1.bf16.msra.mxu1 %v3126_v32 }
 0x265   : > { %1288 = vmatprep.subr.bf16.mxu1 %v3138_v34 }
 0x268   : > { %1289 = vmatpush1.bf16.msra.mxu1 %v3155_v37 }
 0x269   : > { %1290 = vmatprep.subr.bf16.mxu1 %v3170_v40 }
 0x26c   : > { %1291 = vmatpush1.bf16.msra.mxu1 %v3181_v42  ;;  %v1353_v12 = vpop.f32.mrb[16].mxu0 }
 0x26d   : > { %v1362_v58 = vadd.f32 %v1353_v12, %v3315_v43  ;;  %v1355_v57 = vpop.f32.mrb[17].mxu0  ;;  %1292 = vmatprep.subr.bf16.mxu1 %v3194_v45  ;;  %v3914_v43 = vld [vmem:[#allocation21_spill] sm:$0xff] }
 0x26e   : > { %v1363_v59 = vadd.f32 %v1355_v57, %v3317_v14  ;;  %v1357_v9 = vpop.f32.mrb[18].mxu0  ;;  %v3915_v14 = vld [vmem:[#allocation22_spill] sm:$0xff]  ;;  %3924 = vst [vmem:[#allocation21_spill] sm:$0xff] %v3440_v10 }
 0x26f   : > { %v1358_v31 = vpop.f32.mrb[19].mxu0 }
 0x270   : > { %1293 = vmatpush1.bf16.msra.mxu1 %v3212_v49 }
 0x271   : > { %2319 = vmatprep.subr.bf16.mxu1 %v3912_v1 }
 0x273   : > { %1311 = vmatmul.mubr.bf16.vlgmr.msra.gmra.mrb[16].mxu1 %v3348_v7  ;;  %v3921_v7 = vld [vmem:[#allocation18_spill] sm:$0xff] }
 0x274   : > { %2320 = vmatpush3.bf16.msra.mxu1 %v3913_v36  ;;  %2335 = vmatprep.mubr.msk.bf16.mxu1 %vm2798_vm4, %v3912_v1 }
 0x275   : > { %2321 = vmatprep.subr.bf16.mxu1 %v3912_v1 }
 0x278   : > { %2322 = vmatpush3.bf16.msra.mxu1 %v3914_v43 }
 0x279   : > { %2323 = vmatprep.subr.bf16.mxu1 %v3912_v1 }
 0x27c   : > { %2324 = vmatpush3.bf16.msra.mxu1 %v3915_v14 }
 0x27d   : > { %2325 = vmatprep.subr.bf16.mxu1 %v3912_v1 }
 0x280   : > { %2326 = vmatpush3.bf16.msra.mxu1 %v3916_v60 }
 0x281   : > { %2327 = vmatprep.subr.bf16.mxu1 %v3912_v1 }
 0x284   : > { %2328 = vmatpush3.bf16.msra.mxu1 %v3917_v38 }
 0x285   : > { %2329 = vmatprep.subr.bf16.mxu1 %v3912_v1 }
 0x288   : > { %2330 = vmatpush3.bf16.msra.mxu1 %v3918_v56 }
 0x289   : > { %2331 = vmatprep.subr.bf16.mxu1 %v3912_v1 }
 0x28c   : > { %2332 = vmatpush3.bf16.msra.mxu1 %v3919_v48 }
 0x28d   : > { %2333 = vmatprep.subr.bf16.mxu1 %v3912_v1 }
 0x290   : > { %2334 = vmatpush3.bf16.msra.mxu1 %v3920_v50 }
 0x291   : > { %1563 = vmatprep.subr.bf16.mxu1 %v3921_v7 }
 0x326   : > { %v1219_v47 = vpop.f32.mrb[12].mxu1 }
 0x327   : > { %v1220_v52 = vadd.f32 %v3434_v4, %v1219_v47  ;;  %v2317_v63 = vpop.f32.mrb[13].mxu1  ;;  %v3926_v47 = vld [vmem:[#allocation29_spill] sm:$0xff] }
 0x328   : > { %v1222_v8 = vpop.f32.mrb[14].mxu1 }
 0x329   : > { %v1225_v11 = vmax.f32 %v1220_v52, 0.0  ;;  %v2318_v12 = vpop.f32.mrb[15].mxu1  ;;  %v2206_v52 = vmul.f32 -1.442695, %v1363_v59  ;;  %v3450_v59 = vpop.permute.xlu0 %1392 }
 0x32a   : > { %vm1394_vm9 = vcmp.eq.s32.totalorder %v3450_v59, 1 }
 0x32b   : > { %v1232_v57 = vmul.f32 %v3440_v10, %v1225_v11  ;;  %vm2207_vm10 = vmpackc.low %vm1394_vm9, %vm1394_vm9 }
 0x32d   : > { %v1234_v9 = vsel %vm1233_vm8, %v1232_v57, 0.0 }
 0x32e   : > { %1235 = vadd.xlane.f32.xlu0 %v1234_v9 }
 0x346   : > { %v1312_v31 = vpop.f32.mrb[16].mxu1 }
 0x347   : > { %v1360_v6 = vadd.f32 %v1312_v31, %v3925_v55  ;;  %v1314_v3 = vpop.f32.mrb[17].mxu1 }
 0x348   : > { %v1361_v63 = vadd.f32 %v1314_v3, %v3926_v47  ;;  %v1316_v8 = vpop.f32.mrb[18].mxu1 }
 0x349   : > { %v2204_v4 = vmul.f32 -1.442695, %v1360_v6  ;;  %v1317_v7 = vpop.f32.mrb[19].mxu1 }
 0x34a   : > { %v2205_v50 = vmul.f32 -1.442695, %v1361_v63 }
 0x34b   : > { %2594 = vpow2.f32 %v2204_v4 }
 0x34c   : > { %2596 = vpow2.f32 %v2205_v50 }
 0x34d   : > { %2598 = vpow2.f32 %v2206_v52 }
 0x34e   : > { %2600 = vtanh.f32 %v1362_v58 }
 0x355   : > { %v2595_v12 = vpop.eup %2594 }
 0x356   : > { %v2597_v48 = vpop.eup %2596  ;;  %v1367_v11 = vadd.f32 1.0, %v2595_v12  ;;  %v768_v12 = vld [vmem:[#allocation5] sm:$0xff] }
 0x357   : > { %v1373_v57 = vadd.f32 1.0, %v2597_v48  ;;  %v2599_v9 = vpop.eup %2598 }
 0x358   : > { %2602 = vrcp.f32 %v1367_v11  ;;  %v2601_v55 = vpop.eup %2600  ;;  %v1380_v3 = vadd.f32 1.0, %v2599_v9  ;;  %v3933_v9 = vld [vmem:[#allocation20_spill] sm:$0xff] }
 0x359   : > { %2604 = vrcp.f32 %v1373_v57 }
 0x35a   : > { %2606 = vrcp.f32 %v1380_v3 }
 0x362   : > { %v2603_v31 = vpop.eup %2602 }
 0x363   : > { %v2605_v10 = vpop.eup %2604  ;;  %v1384_v47 = vmul.f32 %v2603_v31, %v2601_v55 }
 0x364   : > { %v1383_v6 = vmul.f32 %v2605_v10, %v3335_v53  ;;  %v2607_v50 = vpop.eup %2606 }
 0x366   : > { %v3447_v7 = vadd.f32 %v1384_v47, %v1383_v6 }
 0x368   : > { %2608 = vtanh.f32 %v3447_v7 }
 0x372   : > { %v2609_v58 = vpop.eup %2608 }
 0x373   : > { %v3453_v48 = vmul.f32 %v2609_v58, %v2607_v50  ;;  %v3934_v58 = vld [vmem:[#allocation21_spill] sm:$0xff] }
 0x375   : > { %v3457_v4 = vpack.c.bf16 %v3453_v48, %v3453_v48 }
 0x377   : > { %2336 = vmatmul.mubr.msk.bf16.vlgmr.msra.gmra.mrb[20].mxu1 %vm2207_vm10, %v3457_v4 }
 0x378   : > { %1564 = vmatpush1.bf16.msra.mxu1 %v3031_v16  ;;  %1595 = vmatprep.mubr.bf16.mxu1 %v3911_v54  ;;  %v1632_v16 = vstv %s3870_s28  ;;  %s3942_s28 = sadd.s32 2, %s2983_s16  ;;  %s3946_s16 = scalar_lea.vmem (!%p2225_p10), [#allocation11], %s2979_s21 }
 0x379   : > { %1565 = vmatprep.subr.bf16.mxu1 %v3045_v18  ;;  %v1876_v18 = vstv %s3869_s22  ;;  %p1732_p8 = scmp.lt.s32.totalorder %s3942_s28, %s3543_s12 }
 0x37b   : > { %s1733_s22 = scalar_select %p1732_p8, 1, 0 }
 0x37c   : > { %1566 = vmatpush1.bf16.msra.mxu1 %v3055_v20  ;;  %v3927_v20 = vld [vmem:[#allocation19_spill] sm:$0xff] }
 0x37d   : > { %1567 = vmatprep.subr.bf16.mxu1 %v3068_v22  ;;  %vm1633_vm11 = vcmp.lt.s32.totalorder %v1632_v16, %v3927_v20  ;;  %vm1877_vm12 = vcmp.lt.s32.totalorder %v1876_v18, %v3927_v20 }
 0x37e   : > { %v1634_v22 = vsel %vm1633_vm11, 1, %v3911_v54 }
 0x37f   : > { %1636 = vperm.xlu1 %2509, %v1634_v22  }
 0x380   : > { %1568 = vmatpush1.bf16.msra.mxu1 %v3083_v24  ;;  %v1878_v24 = vsel %vm1877_vm12, 1, %v3911_v54 }
 0x381   : > { %1569 = vmatprep.subr.bf16.mxu1 %v3094_v26 }
 0x383   : > { %1880 = vperm.xlu1 %2509, %v1878_v24  }
 0x384   : > { %1570 = vmatpush1.bf16.msra.mxu1 %v3105_v28 }
 0x385   : > { %1571 = vmatprep.subr.bf16.mxu1 %v3118_v30 }
 0x388   : > { %1572 = vmatpush1.bf16.msra.mxu1 %v3131_v33 }
 0x389   : > { %1573 = vmatprep.subr.bf16.mxu1 %v3145_v35 }
 0x38c   : > { %1574 = vmatpush1.bf16.msra.mxu1 %v3165_v39 }
 0x38d   : > { %1575 = vmatprep.subr.bf16.mxu1 %v3176_v41 }
 0x390   : > { %1576 = vmatpush1.bf16.msra.mxu1 %v3189_v44 }
 0x391   : > { %1577 = vmatprep.subr.bf16.mxu1 %v3202_v46 }
 0x394   : > { %1578 = vmatpush1.bf16.msra.mxu1 %v3217_v51 }
 0x395   : > { %2371 = vmatprep.subr.bf16.mxu1 %v3912_v1 }
 0x397   : > { %1596 = vmatmul.mubr.bf16.vlgmr.msra.gmra.mrb[24].mxu1 %v3457_v4 }
 0x398   : > { %2372 = vmatpush3.bf16.msra.mxu1 %v3290_v62  ;;  %2379 = vmatprep.mubr.msk.bf16.mxu1 %vm2798_vm4, %v3912_v1 }
 0x399   : > { %2373 = vmatprep.subr.bf16.mxu1 %v3912_v1 }
 0x39c   : > { %2374 = vmatpush3.bf16.msra.mxu1 %v3296_v0 }
 0x39d   : > { %2375 = vmatprep.subr.bf16.mxu1 %v3912_v1 }
 0x3a0   : > { %2376 = vmatpush3.bf16.msra.mxu1 %v3303_v2 }
 0x3a1   : > { %2377 = vmatprep.subr.bf16.mxu1 %v3912_v1 }
 0x3a4   : > { %2378 = vmatpush3.bf16.msra.mxu1 %v3380_v5 }
 0x3a5   : > { %1766 = vmatprep.subr.bf16.mxu1 %v3015_v13 }
 0x44a   : > { %v1431_v26 = vpop.f32.mrb[20].mxu1 }
 0x44b   : > { %v1432_v53 = vadd.f32 %v3389_v61, %v1431_v26  ;;  %v2337_v13 = vpop.f32.mrb[21].mxu1  ;;  %v3935_v26 = vld [vmem:[#allocation30_spill] sm:$0xff] }
 0x44c   : > { %v1434_v10 = vpop.f32.mrb[22].mxu1 }
 0x44d   : > { %v1437_v63 = vmax.f32 %v1432_v53, 0.0  ;;  %v2338_v8 = vpop.f32.mrb[23].mxu1  ;;  %v3936_v10 = vld [vmem:[#allocation31_spill] sm:$0xff] }
 0x44f   : > { %v1438_v52 = vpack.c.bf16 %v1437_v63, %v1437_v63 }
 0x451   : > { %2348 = vmatmul.mubr.msk.bf16.vlgmr.msra.gmra.mrb[20].mxu0 %vm1181_vm7, %v1438_v52 }
 0x452   : > { %1523 = vmatpush1.bf16.msra.mxu0 %v3025_v15  ;;  %1554 = vmatprep.mubr.bf16.mxu0 %v3911_v54 }
 0x453   : > { %1524 = vmatprep.subr.bf16.mxu0 %v3038_v17  ;;  %v3928_v17 = vld [vmem:[#allocation32_spill] sm:$0xff] }
 0x456   : > { %1525 = vmatpush1.bf16.msra.mxu0 %v3050_v19 }
 0x457   : > { %1526 = vmatprep.subr.bf16.mxu0 %v3062_v21 }
 0x45a   : > { %1527 = vmatpush1.bf16.msra.mxu0 %v3076_v23  ;;  %v3929_v23 = vld [vmem:[#allocation34_spill] sm:$0xff] }
 0x45b   : > { %1528 = vmatprep.subr.bf16.mxu0 %v3088_v25 }
 0x45e   : > { %1529 = vmatpush1.bf16.msra.mxu0 %v3100_v27 }
 0x45f   : > { %1530 = vmatprep.subr.bf16.mxu0 %v3112_v29 }
 0x462   : > { %1531 = vmatpush1.bf16.msra.mxu0 %v3126_v32  ;;  %v3930_v32 = vld [vmem:[#allocation26_spill] sm:$0xff] }
 0x463   : > { %1532 = vmatprep.subr.bf16.mxu0 %v3138_v34  ;;  %v3931_v34 = vld [vmem:[#allocation27_spill] sm:$0xff] }
 0x466   : > { %1533 = vmatpush1.bf16.msra.mxu0 %v3155_v37  ;;  %v3932_v37 = vld [vmem:[#allocation18_spill] sm:$0xff] }
 0x467   : > { %1534 = vmatprep.subr.bf16.mxu0 %v3170_v40  ;;  %v3547_v40 = vld [vmem:[#allocation9] ss:$0 sm:$0xff] }
 0x46a   : > { %1535 = vmatpush1.bf16.msra.mxu0 %v3181_v42  ;;  %v1597_v15 = vpop.f32.mrb[24].mxu1  ;;  %v1236_v42 = vpop.xlane.xlu0 %1235 }
 0x46b   : > { %v3518_v19 = vadd.f32 %v1597_v15, %v3928_v17  ;;  %v1599_v21 = vpop.f32.mrb[25].mxu1  ;;  %1536 = vmatprep.subr.bf16.mxu0 %v3194_v45  ;;  %v1246_v45 = vstv %s1245_s20 }
 0x46c   : > { %v1607_v25 = vadd.f32 %v1599_v21, %v3929_v23  ;;  %v1601_v27 = vpop.f32.mrb[26].mxu1  ;;  %vm1247_vm13 = vcmp.eq.s32.totalorder %v1246_v45, 1 }
 0x46d   : > { %v1602_v29 = vpop.f32.mrb[27].mxu1 }
 0x46e   : > { %1537 = vmatpush1.bf16.msra.mxu0 %v3212_v49  ;;  %v1243_v49 = vadd.f32 %v3547_v40, %v1236_v42  ;;  %v2213_v21 = vmul.f32 -1.442695, %v1607_v25  ;;  %v3569_v25 = vpop.permute.xlu1 %1636 }
 0x46f   : > { %2351 = vmatprep.subr.bf16.mxu0 %v3912_v1  ;;  %vm1638_vm14 = vcmp.eq.s32.totalorder %v3569_v25, 1 }
 0x470   : > { %v3550_v11 = vsel %vm1247_vm13, %v1243_v49, -1e+30  ;;  %vm2214_vm15 = vmpackc.low %vm1638_vm14, %vm1638_vm14 }
 0x471   : > { %1555 = vmatmul.mubr.bf16.vlgmr.msra.gmra.mrb[24].mxu0 %v3457_v4  ;;  %v3554_v3 = vmax.f32 %v768_v12, %v3550_v11 }
 0x472   : > { %2352 = vmatpush3.bf16.msra.mxu0 %v3913_v36  ;;  %2367 = vmatprep.mubr.msk.bf16.mxu0 %vm2798_vm4, %v3912_v1 }
 0x473   : > { %2353 = vmatprep.subr.bf16.mxu0 %v3912_v1  ;;  %v1250_v16 = vsub.f32 %v768_v12, %v3554_v3 }
 0x475   : > { %v1251_v20 = vmul.f32 1.442695, %v1250_v16  ;;  %v2659_v16 = vld [vmem:[%s3824_s4 + $0x2c] ss:$16 sps:$4 sm:$0xff]  }
 0x476   : > { %2354 = vmatpush3.bf16.msra.mxu0 %v3914_v43 }
 0x477   : > { %2355 = vmatprep.subr.bf16.mxu0 %v3912_v1  ;;  %2610 = vpow2.f32 %v1251_v20  ;;  %v2661_v20 = vld [vmem:[%s3824_s4 + $0x4c] ss:$16 sps:$4 sm:$0xff]  }
 0x47a   : > { %2356 = vmatpush3.bf16.msra.mxu0 %v3915_v14 }
 0x47b   : > { %2357 = vmatprep.subr.bf16.mxu0 %v3912_v1 }
 0x47e   : > { %2358 = vmatpush3.bf16.msra.mxu0 %v3916_v60 }
 0x47f   : > { %2359 = vmatprep.subr.bf16.mxu0 %v3912_v1 }
 0x481   : > { %v3559_v22 = vpop.eup %2610 }
 0x482   : > { %2360 = vmatpush3.bf16.msra.mxu0 %v3917_v38 }
 0x483   : > { %2361 = vmatprep.subr.bf16.mxu0 %v3912_v1 }
 0x486   : > { %2362 = vmatpush3.bf16.msra.mxu0 %v3918_v56 }
 0x487   : > { %2363 = vmatprep.subr.bf16.mxu0 %v3912_v1 }
 0x48a   : > { %2364 = vmatpush3.bf16.msra.mxu0 %v3930_v32 }
 0x48b   : > { %2365 = vmatprep.subr.bf16.mxu0 %v3912_v1 }
 0x48e   : > { %2366 = vmatpush3.bf16.msra.mxu0 %v3931_v34 }
 0x48f   : > { %1807 = vmatprep.subr.bf16.mxu0 %v3932_v37 }
 0x524   : > { %v1476_v57 = vpop.f32.mrb[20].mxu0 }
 0x525   : > { %v1477_v55 = vadd.f32 %v3933_v9, %v1476_v57  ;;  %v2349_v31 = vpop.f32.mrb[21].mxu0 }
 0x526   : > { %v1479_v47 = vpop.f32.mrb[22].mxu0 }
 0x527   : > { %v1482_v6 = vmax.f32 %v1477_v55, 0.0  ;;  %v2350_v50 = vpop.f32.mrb[23].mxu0 }
 0x529   : > { %v1483_v4 = vmul.f32 %v3934_v58, %v1482_v6 }
 0x52b   : > { %v1484_v18 = vsel %vm1233_vm8, %v1483_v4, 0.0  ;;  %v2658_v4 = vld [vmem:[%s3824_s4 + $0x8] ss:$16 sps:$4 sm:$0xff]  }
 0x52c   : > { %1485 = vadd.xlane.f32.xlu1 %v1484_v18  ;;  %v2660_v18 = vld [vmem:[%s3824_s4 + $0x28] ss:$16 sps:$4 sm:$0xff]  }
 0x53d   : > { %1260 = vperm.xlu1 %2509, %v3559_v22  }
 0x544   : > { %v1556_v24 = vpop.f32.mrb[24].mxu0 }
 0x545   : > { %v1604_v53 = vadd.f32 %v1556_v24, %v3935_v26  ;;  %v1558_v13 = vpop.f32.mrb[25].mxu0  ;;  %v2662_v24 = vld [vmem:[%s3824_s4 + $0x48] ss:$16 sps:$4 sm:$0xff]   ;;  %v2663_v26 = vld [vmem:[%s3824_s4 + $0x6c] ss:$16 sps:$4 sm:$0xff]  }
 0x546   : > { %v1605_v63 = vadd.f32 %v1558_v13, %v3936_v10  ;;  %v1560_v8 = vpop.f32.mrb[26].mxu0 }
 0x547   : > { %v2211_v52 = vmul.f32 -1.442695, %v1604_v53  ;;  %v1561_v15 = vpop.f32.mrb[27].mxu0 }
 0x548   : > { %v2212_v17 = vmul.f32 -1.442695, %v1605_v63 }
 0x549   : > { %2612 = vpow2.f32 %v2211_v52 }
 0x54a   : > { %2614 = vpow2.f32 %v2212_v17 }
 0x54b   : > { %2616 = vpow2.f32 %v2213_v21 }
 0x54c   : > { %2618 = vtanh.f32 %v3518_v19 }
 0x553   : > { %v2613_v23 = vpop.eup %2612 }
 0x554   : > { %v2615_v27 = vpop.eup %2614  ;;  %v1611_v29 = vadd.f32 1.0, %v2613_v23 }
 0x555   : > { %v1617_v37 = vadd.f32 1.0, %v2615_v27  ;;  %v2617_v42 = vpop.eup %2616 }
 0x556   : > { %2620 = vrcp.f32 %v1611_v29  ;;  %v2619_v45 = vpop.eup %2618  ;;  %v1624_v57 = vadd.f32 1.0, %v2617_v42  ;;  %v2666_v42 = vld [vmem:[%s3824_s4 + $0x20] ss:$16 sps:$4 sm:$0xff]  }
 0x557   : > { %2622 = vrcp.f32 %v1617_v37  ;;  %v2665_v37 = vld [vmem:[%s3824_s4 + $0x24] ss:$16 sps:$4 sm:$0xff]  }
 0x558   : > { %2624 = vrcp.f32 %v1624_v57  ;;  %v2671_v57 = vld [vmem:[%s3824_s4 + $0x84] ss:$16 sps:$4 sm:$0xff]  }
 0x560   : > { %v2621_v49 = vpop.eup %2620 }
 0x561   : > { %v2623_v12 = vpop.eup %2622  ;;  %v1628_v55 = vmul.f32 %v2621_v49, %v2619_v45  ;;  %v2667_v45 = vld [vmem:[%s3824_s4 + $0x44] ss:$16 sps:$4 sm:$0xff]   ;;  %v2668_v49 = vld [vmem:[%s3824_s4 + $0x40] ss:$16 sps:$4 sm:$0xff]  }
 0x562   : > { %v1627_v31 = vmul.f32 %v2623_v12, %v3447_v7  ;;  %v2625_v6 = vpop.eup %2624  ;;  %v2670_v12 = vld [vmem:[%s3824_s4 + $0x60] ss:$16 sps:$4 sm:$0xff]  }
 0x564   : > { %v3566_v47 = vadd.f32 %v1628_v55, %v1627_v31  ;;  %v2672_v55 = vld [vmem:[%s3824_s4 + $0x80] ss:$16 sps:$4 sm:$0xff]   ;;  %v2673_v31 = vld [vmem:[%s3824_s4 + $0xa4] ss:$16 sps:$4 sm:$0xff]  }
 0x566   : > { %2626 = vtanh.f32 %v3566_v47 }
 0x570   : > { %v2627_v19 = vpop.eup %2626 }
 0x571   : > { %v3572_v50 = vmul.f32 %v2627_v19, %v2625_v6  ;;  %v2674_v6 = vld [vmem:[%s3824_s4 + $0xa0] ss:$16 sps:$4 sm:$0xff]   ;;  %v2675_v19 = vld [vmem:[%s3824_s4 + $0xc4] ss:$16 sps:$4 sm:$0xff]  }
 0x573   : > { %v3579_v7 = vpack.c.bf16 %v3572_v50, %v3572_v50 }
 0x575   : > { %2368 = vmatmul.mubr.msk.bf16.vlgmr.msra.gmra.mrb[28].mxu0 %vm2214_vm15, %v3579_v7 }
 0x576   : > { %1808 = vmatpush1.bf16.msra.mxu0 %v2658_v4  ;;  %1839 = vmatprep.mubr.bf16.mxu0 %v3911_v54  ;;  %v2676_v4 = vld [vmem:[%s3824_s4 + $0xc0] ss:$16 sps:$4 sm:$0xff]  }
 0x577   : > { %1809 = vmatprep.subr.bf16.mxu0 %v2659_v16 }
 0x57a   : > { %1810 = vmatpush1.bf16.msra.mxu0 %v2660_v18  ;;  %v3938_v18 = vld [vmem:[#allocation36_spill] sm:$0xff] }
 0x57b   : > { %1811 = vmatprep.subr.bf16.mxu0 %v2661_v20 }
 0x57e   : > { %1812 = vmatpush1.bf16.msra.mxu0 %v2662_v24 }
 0x57f   : > { %1813 = vmatprep.subr.bf16.mxu0 %v2663_v26  ;;  %v2677_v26 = vld [vmem:[%s3824_s4 + $0xe4] ss:$16 sps:$4 sm:$0xff]  }
 0x582   : > { %1814 = vmatpush1.bf16.msra.mxu0 %v3105_v28  ;;  %v3624_v28 = vpop.permute.xlu1 %1880 }
 0x583   : > { %1815 = vmatprep.subr.bf16.mxu0 %v3118_v30  ;;  %v1490_v30 = vstv %s1489_s25  ;;  %vm1882_vm1 = vcmp.eq.s32.totalorder %v3624_v28, 1 }
 0x584   : > { %vm1491_vm0 = vcmp.eq.s32.totalorder %v1490_v30, 1  ;;  %v3939_v30 = vld [vmem:[#allocation37_spill] sm:$0xff]  ;;  %vm2221_vm2 = vmpackc.low %vm1882_vm1, %vm1882_vm1 }
 0x586   : > { %1816 = vmatpush1.bf16.msra.mxu0 %v3131_v33  ;;  %v1253_v33 = vsub.f32 %v3550_v11, %v3554_v3 }
 0x587   : > { %1817 = vmatprep.subr.bf16.mxu0 %v3145_v35 }
 0x58a   : > { %1818 = vmatpush1.bf16.msra.mxu0 %v3165_v39 }
 0x58b   : > { %1819 = vmatprep.subr.bf16.mxu0 %v3176_v41 }
 0x58e   : > { %1820 = vmatpush1.bf16.msra.mxu0 %v3189_v44  ;;  %v1254_v44 = vmul.f32 1.442695, %v1253_v33 }
 0x58f   : > { %1821 = vmatprep.subr.bf16.mxu0 %v3202_v46 }
 0x590   : > { %2628 = vpow2.f32 %v1254_v44 }
 0x592   : > { %1822 = vmatpush1.bf16.msra.mxu0 %v3217_v51 }
 0x593   : > { %2403 = vmatprep.subr.bf16.mxu0 %v3912_v1 }
 0x595   : > { %1840 = vmatmul.mubr.bf16.vlgmr.msra.gmra.mrb[32].mxu0 %v3579_v7 }
 0x596   : > { %2404 = vmatpush3.bf16.msra.mxu0 %v3290_v62  ;;  %2411 = vmatprep.mubr.msk.bf16.mxu0 %vm2798_vm4, %v3912_v1 }
 0x597   : > { %2405 = vmatprep.subr.bf16.mxu0 %v3912_v1 }
 0x59a   : > { %2406 = vmatpush3.bf16.msra.mxu0 %v3296_v0  ;;  %v3636_v53 = vpop.eup %2628 }
 0x59b   : > { %2407 = vmatprep.subr.bf16.mxu0 %v3912_v1 }
 0x59e   : > { %2408 = vmatpush3.bf16.msra.mxu0 %v3303_v2 }
 0x59f   : > { %2409 = vmatprep.subr.bf16.mxu0 %v3912_v1 }
 0x5a2   : > { %2410 = vmatpush3.bf16.msra.mxu0 %v3380_v5  ;;  %v769_v5 = vld [vmem:[#allocation6] sm:$0xff] }
 0x5a3   : > { %v1256_v11 = vmul.f32 %v3559_v22, %v769_v5  ;;  %v2664_v22 = vld [vmem:[%s3824_s4] ss:$16 sps:$4 sm:$0xff]  }
 0x5a5   : > { %v1257_v13 = vadd.f32 %v3636_v53, %v1256_v11 }
 0x5b9   : > { %v1486_v35 = vpop.xlane.xlu1 %1485 }
 0x5ba   : > { %v1487_v39 = vadd.f32 %v3547_v40, %v1486_v35 }
 0x5bc   : > { %v1492_v41 = vsel %vm1491_vm0, %v1487_v39, -1e+30 }
 0x5bd   : > { %v3630_v46 = vmax.f32 %v3554_v3, %v1492_v41 }
 0x5bf   : > { %v1494_v51 = vsub.f32 %v3554_v3, %v3630_v46  ;;  %v1497_v62 = vsub.f32 %v1492_v41, %v3630_v46  ;;  %v2678_v41 = vld [vmem:[%s3824_s4 + $0xe0] ss:$16 sps:$4 sm:$0xff]  }
 0x5c1   : > { %v1495_v0 = vmul.f32 1.442695, %v1494_v51  ;;  %v1498_v2 = vmul.f32 1.442695, %v1497_v62  ;;  %v3940_v62 = vld [vmem:[#allocation33_spill] sm:$0xff] }
 0x5c3   : > { %2630 = vpow2.f32 %v1495_v0 }
 0x5c4   : > { %2632 = vpow2.f32 %v1498_v2  ;;  %v3941_v2 = vld [vmem:[#allocation35_spill] sm:$0xff] }
 0x5cd   : > { %v2631_v10 = vpop.eup %2630 }
 0x5ce   : > { %1504 = vperm.xlu1 %2509, %v2631_v10   ;;  %v1500_v63 = vmul.f32 %v2631_v10, %v1257_v13  ;;  %v2633_v8 = vpop.eup %2632 }
 0x5d0   : > { %v3639_v52 = vadd.f32 %v2633_v8, %v1500_v63 }
 0x5d2   : > { %1510 = vperm.xlu1 %2509, %v2633_v8  }
 0x648   : > { %v1675_v3 = vpop.f32.mrb[28].mxu0 }
 0x649   : > { %v1676_v15 = vadd.f32 %v3389_v61, %v1675_v3  ;;  %v2369_v17 = vpop.f32.mrb[29].mxu0 }
 0x64a   : > { %v1678_v21 = vpop.f32.mrb[30].mxu0 }
 0x64b   : > { %v1681_v23 = vmax.f32 %v1676_v15, 0.0  ;;  %v2370_v27 = vpop.f32.mrb[31].mxu0 }
 0x64d   : > { %v1682_v29 = vpack.c.bf16 %v1681_v23, %v1681_v23 }
 0x64f   : > { %2380 = vmatmul.mubr.msk.bf16.vlgmr.msra.gmra.mrb[28].mxu1 %vm1181_vm7, %v1682_v29 }
 0x650   : > { %1767 = vmatpush1.bf16.msra.mxu1 %v2664_v22  ;;  %1798 = vmatprep.mubr.bf16.mxu1 %v3911_v54  ;;  %v2669_v54 = vld [vmem:[%s3824_s4 + $0x64] ss:$16 sps:$4 sm:$0xff]  }
 0x651   : > { %1768 = vmatprep.subr.bf16.mxu1 %v2665_v37 }
 0x654   : > { %1769 = vmatpush1.bf16.msra.mxu1 %v2666_v42 }
 0x655   : > { %1770 = vmatprep.subr.bf16.mxu1 %v2667_v45 }
 0x658   : > { %1771 = vmatpush1.bf16.msra.mxu1 %v2668_v49 }
 0x659   : > { %1772 = vmatprep.subr.bf16.mxu1 %v2669_v54 }
 0x65c   : > { %1773 = vmatpush1.bf16.msra.mxu1 %v2670_v12 }
 0x65d   : > { %1774 = vmatprep.subr.bf16.mxu1 %v2671_v57 }
 0x660   : > { %1775 = vmatpush1.bf16.msra.mxu1 %v2672_v55 }
 0x661   : > { %1776 = vmatprep.subr.bf16.mxu1 %v2673_v31 }
 0x664   : > { %1777 = vmatpush1.bf16.msra.mxu1 %v2674_v6 }
 0x665   : > { %1778 = vmatprep.subr.bf16.mxu1 %v2675_v19 }
 0x668   : > { %1779 = vmatpush1.bf16.msra.mxu1 %v2676_v4  ;;  %v1841_v16 = vpop.f32.mrb[32].mxu0 }
 0x669   : > { %v1850_v20 = vadd.f32 %v1841_v16, %v3938_v18  ;;  %v1843_v24 = vpop.f32.mrb[33].mxu0  ;;  %1780 = vmatprep.subr.bf16.mxu1 %v2677_v26 }
 0x66a   : > { %v1851_v33 = vadd.f32 %v1843_v24, %v3939_v30  ;;  %v1845_v35 = vpop.f32.mrb[34].mxu0 }
 0x66b   : > { %v1846_v39 = vpop.f32.mrb[35].mxu0 }
 0x66c   : > { %1781 = vmatpush1.bf16.msra.mxu1 %v2678_v41  ;;  %v2220_v10 = vmul.f32 -1.442695, %v1851_v33 }
 0x66d   : > { %2383 = vmatprep.subr.bf16.mxu1 %v3912_v1 }
 0x66f   : > { %1799 = vmatmul.mubr.bf16.vlgmr.msra.gmra.mrb[32].mxu1 %v3579_v7 }
 0x670   : > { %2384 = vmatpush3.bf16.msra.mxu1 %v3913_v36  ;;  %2399 = vmatprep.mubr.msk.bf16.mxu1 %vm2798_vm4, %v3912_v1 }
 0x671   : > { %2385 = vmatprep.subr.bf16.mxu1 %v3912_v1 }
 0x674   : > { %2386 = vmatpush3.bf16.msra.mxu1 %v3914_v43 }
 0x675   : > { %2387 = vmatprep.subr.bf16.mxu1 %v3912_v1 }
 0x678   : > { %2388 = vmatpush3.bf16.msra.mxu1 %v3915_v14 }
 0x679   : > { %2389 = vmatprep.subr.bf16.mxu1 %v3912_v1 }
 0x67c   : > { %2390 = vmatpush3.bf16.msra.mxu1 %v3916_v60 }
 0x67d   : > { %2391 = vmatprep.subr.bf16.mxu1 %v3912_v1 }
 0x680   : > { %2392 = vmatpush3.bf16.msra.mxu1 %v3917_v38 }
 0x681   : > { %2393 = vmatprep.subr.bf16.mxu1 %v3912_v1 }
 0x684   : > { %2394 = vmatpush3.bf16.msra.mxu1 %v3918_v56 }
 0x685   : > { %2395 = vmatprep.subr.bf16.mxu1 %v3912_v1 }
 0x688   : > { %2396 = vmatpush3.bf16.msra.mxu1 %v3930_v32 }
 0x689   : > { %2397 = vmatprep.subr.bf16.mxu1 %v3912_v1 }
 0x68c   : > { %2398 = vmatpush3.bf16.msra.mxu1 %v3931_v34 }
 0x722   : > { %v1720_v36 = vpop.f32.mrb[28].mxu1 }
 0x723   : > { %v1721_v43 = vadd.f32 %v3933_v9, %v1720_v36  ;;  %v2381_v14 = vpop.f32.mrb[29].mxu1 }
 0x724   : > { %v1723_v60 = vpop.f32.mrb[30].mxu1 }
 0x725   : > { %v1726_v7 = vmax.f32 %v1721_v43, 0.0  ;;  %v2382_v44 = vpop.f32.mrb[31].mxu1 }
 0x727   : > { %v1727_v38 = vmul.f32 %v3934_v58, %v1726_v7 }
 0x729   : > { %v1728_v51 = vsel %vm1233_vm8, %v1727_v38, 0.0 }
 0x72a   : > { %1729 = vadd.xlane.f32.xlu0 %v1728_v51 }
 0x742   : > { %v1800_v56 = vpop.f32.mrb[32].mxu1 }
 0x743   : > { %v1848_v0 = vadd.f32 %v1800_v56, %v3940_v62  ;;  %v1802_v32 = vpop.f32.mrb[33].mxu1  ;;  %v1978_v56 = vstv %s1977_s0  ;;  %v1261_v62 = vpop.permute.xlu1 %1260 }
 0x744   : > { %v1849_v1 = vadd.f32 %v1802_v32, %v3941_v2  ;;  %v1804_v5 = vpop.f32.mrb[34].mxu1  ;;  %vm1979_vm4 = vcmp.eq.s32.totalorder %v1978_v56, 1 }
 0x745   : > { %v2218_v34 = vmul.f32 -1.442695, %v1848_v0  ;;  %v1805_v11 = vpop.f32.mrb[35].mxu1 }
 0x746   : > { %v2219_v13 = vmul.f32 -1.442695, %v1849_v1 }
 0x747   : > { %2634 = vpow2.f32 %v2218_v34  ;;  %v1505_v2 = vpop.permute.xlu1 %1504 }
 0x748   : > { %2636 = vpow2.f32 %v2219_v13 }
 0x749   : > { %2638 = vpow2.f32 %v2220_v10  ;;  %v3944_v10 = vld [vmem:[#allocation39_spill] sm:$0xff] }
 0x74a   : > { %2640 = vtanh.f32 %v1850_v20 }
 0x751   : > { %v2635_v63 = vpop.eup %2634 }
 0x752   : > { %v2637_v8 = vpop.eup %2636  ;;  %v1855_v3 = vadd.f32 1.0, %v2635_v63 }
 0x753   : > { %v1861_v15 = vadd.f32 1.0, %v2637_v8  ;;  %v2639_v17 = vpop.eup %2638  ;;  %v1053_v8 = vsel %vm1052_vm5, %v3944_v10, 0.0 }
 0x754   : > { %2642 = vrcp.f32 %v1855_v3  ;;  %v2641_v21 = vpop.eup %2640  ;;  %v1868_v29 = vadd.f32 1.0, %v2639_v17  ;;  %v1511_v17 = vpop.permute.xlu1 %1510 }
 0x755   : > { %2644 = vrcp.f32 %v1861_v15 }
 0x756   : > { %2646 = vrcp.f32 %v1868_v29 }
 0x75e   : > { %v2643_v23 = vpop.eup %2642 }
 0x75f   : > { %v2645_v27 = vpop.eup %2644  ;;  %v1872_v22 = vmul.f32 %v2643_v23, %v2641_v21  ;;  %v1395_v21 = vsel %vm1394_vm9, %v3453_v48, 0.0 }
 0x760   : > { %v1871_v37 = vmul.f32 %v2645_v27, %v3566_v47  ;;  %v2647_v45 = vpop.eup %2646  ;;  %v1734_v47 = vstv %s1733_s22  ;;  %v1513_v23 = vmul.f32 %v1511_v17, %v1395_v21 }
 0x761   : > { %vm1735_vm3 = vcmp.eq.s32.totalorder %v1734_v47, 1 }
 0x762   : > { %v1873_v42 = vadd.f32 %v1872_v22, %v1871_v37  ;;  %v1639_v37 = vsel %vm1638_vm14, %v3572_v50, 0.0 }
 0x764   : > { %2648 = vtanh.f32 %v1873_v42  ;;  %2004 = vst [vmem:[#allocation4] sm:$0xff] %v1873_v42 }
 0x76e   : > { %v2649_v49 = vpop.eup %2648 }
 0x76f   : > { %v3717_v54 = vmul.f32 %v2649_v49, %v2647_v45 }
 0x771   : > { %v2222_v12 = vpack.c.bf16 %v3717_v54, %v3717_v54  ;;  %2003 = vst [vmem:[#allocation3] sm:$0xff] %v3717_v54  ;;  %v1883_v48 = vsel %vm1882_vm1, %v3717_v54, 0.0 }
 0x773   : > { %2400 = vmatmul.mubr.msk.bf16.vlgmr.msra.gmra.mrb[36].mxu1 %vm2221_vm2, %v2222_v12 }
 0x7b7   : > { %v1730_v57 = vpop.xlane.xlu0 %1729 }
 0x7b8   : > { %v1731_v55 = vadd.f32 %v3547_v40, %v1730_v57 }
 0x7ba   : > { %v1736_v31 = vsel %vm1735_vm3, %v1731_v55, -1e+30 }
 0x7bb   : > { %v1737_v6 = vmax.f32 %v3630_v46, %v1736_v31 }
 0x7bd   : > { %v1738_v19 = vsub.f32 %v3630_v46, %v1737_v6  ;;  %v1741_v4 = vsub.f32 %v1736_v31, %v1737_v6 }
 0x7bf   : > { %v1739_v16 = vmul.f32 1.442695, %v1738_v19  ;;  %v1742_v18 = vmul.f32 1.442695, %v1741_v4  ;;  %v2799_v4 = vmov (!%p2225_p10), 0  }
 0x7c1   : > { %2650 = vpow2.f32 %v1739_v16 }
 0x7c2   : > { %2652 = vpow2.f32 %v1742_v18 }
 0x7cb   : > { %v2651_v20 = vpop.eup %2650 }
 0x7cc   : > { %v2653_v24 = vpop.eup %2652  ;;  %v1744_v26 = vmul.f32 %v2651_v20, %v3639_v52 }
 0x7cd   : > { %1754 = vperm.xlu1 %2509, %v2653_v24  }
 0x7ce   : > { %v1745_v30 = vadd.f32 %v2653_v24, %v1744_v26 }
 0x846   : > { %v1919_v33 = vpop.f32.mrb[36].mxu1 }
 0x847   : > { %v1920_v35 = vadd.f32 %v3389_v61, %v1919_v33  ;;  %v2401_v39 = vpop.f32.mrb[37].mxu1 }
 0x848   : > { %v1922_v41 = vpop.f32.mrb[38].mxu1 }
 0x849   : > { %v1925_v36 = vmax.f32 %v1920_v35, 0.0  ;;  %v2402_v46 = vpop.f32.mrb[39].mxu1 }
 0x84b   : > { %v1926_v43 = vpack.c.bf16 %v1925_v36, %v1925_v36 }
 0x84c   : > { %v1755_v29 = vpop.permute.xlu1 %1754 }
 0x84d   : > { %2412 = vmatmul.mubr.msk.bf16.vlgmr.msra.gmra.mrb[36].mxu0 %vm1181_vm7, %v1926_v43  ;;  %v1757_v45 = vmul.f32 %v1755_v29, %v1639_v37 }
 0x920   : > { %v1964_v14 = vpop.f32.mrb[36].mxu0 }
 0x921   : > { %v1965_v60 = vadd.f32 %v3933_v9, %v1964_v14  ;;  %v2413_v7 = vpop.f32.mrb[37].mxu0 }
 0x922   : > { %v1967_v44 = vpop.f32.mrb[38].mxu0 }
 0x923   : > { %v1970_v52 = vmax.f32 %v1965_v60, 0.0  ;;  %v2414_v38 = vpop.f32.mrb[39].mxu0 }
 0x925   : > { %v1971_v51 = vmul.f32 %v3934_v58, %v1970_v52  ;;  %v770_v58 = vld [vmem:[#allocation7] sm:$0xff] }
 0x926   : > { %v1263_v3 = vmul.f32 %v1261_v62, %v770_v58 }
 0x927   : > { %v1972_v61 = vsel %vm1233_vm8, %v1971_v51, 0.0 }
 0x928   : > { %1973 = vadd.xlane.f32.xlu0 %v1972_v61 }
 0x93e   : > { %1266 = vperm.xlu0 %2508, %v3636_v53  }
 0x942   : > { %1748 = vperm.xlu0 %2508, %v2651_v20  }
 0x9b5   : > { %v1974_v0 = vpop.xlane.xlu0 %1973 }
 0x9b6   : > { %v1975_v9 = vadd.f32 %v3547_v40, %v1974_v0 }
 0x9b8   : > { %v1980_v32 = vsel %vm1979_vm4, %v1975_v9, -1e+30 }
 0x9b9   : > { %v1981_v1 = vmax.f32 %v1737_v6, %v1980_v32 }
 0x9bb   : > { %v1982_v5 = vsub.f32 %v1737_v6, %v1981_v1  ;;  %v1985_v34 = vsub.f32 %v1980_v32, %v1981_v1  ;;  %2006 = vst.msk [vmem:[#allocation5] sm:$0xff] %vm2005_vm6, %v1981_v1 }
 0x9bd   : > { %v1983_v53 = vmul.f32 1.442695, %v1982_v5  ;;  %v1986_v11 = vmul.f32 1.442695, %v1985_v34  ;;  %v1267_v13 = vpop.permute.xlu0 %1266 }
 0x9be   : > { %v1269_v15 = vmul.f32 %v1267_v13, %v1053_v8 }
 0x9bf   : > { %2654 = vpow2.f32 %v1983_v53 }
 0x9c0   : > { %2656 = vpow2.f32 %v1986_v11  ;;  %v1270_v40 = vadd.f32 %v1269_v15, %v1263_v3 }
 0x9c1   : > { %v1749_v42 = vpop.permute.xlu0 %1748 }
 0x9c2   : > { %v1507_v27 = vmul.f32 %v1505_v2, %v1270_v40 }
 0x9c4   : > { %v1514_v22 = vadd.f32 %v1513_v23, %v1507_v27 }
 0x9c6   : > { %v1751_v49 = vmul.f32 %v1749_v42, %v1514_v22 }
 0x9c8   : > { %v1758_v12 = vadd.f32 %v1757_v45, %v1751_v49 }
 0x9c9   : > { %v2655_v47 = vpop.eup %2654 }
 0x9ca   : > { %v2657_v57 = vpop.eup %2656  ;;  %v1988_v55 = vmul.f32 %v2655_v47, %v1745_v30  ;;  %1992 = vperm.xlu0 %2508, %v2655_v47  }
 0x9cb   : > { %1998 = vperm.xlu1 %2509, %v2657_v57  }
 0x9cc   : > { %v1989_v31 = vadd.f32 %v2657_v57, %v1988_v55 }
 0x9ce   : > { %2007 = vst.msk [vmem:[#allocation6] sm:$0xff] %vm2005_vm6, %v1989_v31  ;;  %2680 = vrcp.f32 (!%p2225_p10), %v1989_v31  ;;  %2679 = vset.pattern.permute.xlu0 (!%p2225_p10), %v2799_v4 }
 0x9d8   : > { %v2681_v16 = vpop.eup (!%p2225_p10), %2680 }
 0x9d9   : > { %2016 = vperm.xlu0 (!%p2225_p10), %2679, %v2681_v16  }
 0xa49   : > { %v1993_v59 = vpop.permute.xlu0 %1992  ;;  %2012 = sbr.rel (%p2225_p10) target bundleno = 2652 (0xa5c), region = 117 }
 0xa4a   : > { %v1999_v6 = vpop.permute.xlu1 %1998  ;;  %v1995_v25 = vmul.f32 %v1993_v59, %v1758_v12 }
 0xa4b   : > { %v2001_v50 = vmul.f32 %v1999_v6, %v1883_v48 }
 0xa4d   : > { %v2002_v19 = vadd.f32 %v2001_v50, %v1995_v25 }
 0xa4f   : > { %2008 = vst [vmem:[#allocation7] sm:$0xff] %v2002_v19 }
 0xa58   : > { %v2017_v18 = vpop.permute.xlu0 %2016 }
 0xa59   : > { %v2019_v20 = vmul.f32 %v2017_v18, %v2002_v19 }
 0xa5b   : > { %2020 = vst [vmem:[%s3946_s16] sm:$0xff] %v2019_v20 }
 0xa5c PF: > { %s2227_s12 = sshll.u32 %s2780_s2, 7  ;;  %s3947_s30 = sld [smem:[#allocation44_spill]] }
 0xa5d   : > { %s3949_s1 = scalar_lea.vmem [#allocation11], %s2979_s21  ;;  %s3950_s28 = sand.u32 1, %s2760_s26  }
 0xa5e   : > { %s2035_s25 = sshll.u32 %s3949_s1, 4  ;;  %s2022_s22 = scalar_lea.sflag [#allocation12], %s3950_s28  ;;  %s2036_s25 = int_to_ptr.vmem [resolvable:$true] %s2035_s25 }
 0xa5f   : > { %s2682_s24 = scalar_lea.vmem %s2036_s25, 128  ;;  %s2800_s0 = smov [#allocation11]  }
 0xa60   : > { %p2683_p11 = scmp.ne.s32.totalorder %s2036_s25, %s2682_s24  ;;  %s2686_s16 = sshll.u32 %s2800_s0, 4  ;;  %s2687_s16 = int_to_ptr.vmem [resolvable:$false] %s2686_s16 }
 0xa61   : > { %s2688_s3 = scalar_lea.vmem %s2687_s16, 256  ;;  %p2689_p1 = scmp.lt.s32.totalorder %s2036_s25, %s2687_s16 }
 0xa62   : > { %s3948_s17 = smov %s3947_s30  ;;  %s3763_s18 = scalar_lea.hbm %s3947_s30, %s2227_s12 }
 0xa63   : > { %p2684_p13 = pnand %p2683_p11, %p2944_p7  ;;  %p2690_p2 = scmp.lt.s32.totalorder %s2688_s3, %s2682_s24 }
 0xa65   : > { %p2685_p0 = pneg %p2684_p13  ;;  %p2691_p3 = por %p2690_p2, %p2689_p1 }
 0xa67   : > { %p2692_p4 = pnand %p2691_p3, %p2685_p0 }
 0xa69   : > { %2695 = shalt.err (!%p2692_p4)
}
 0xa6a   : > { %s2696_s2 = scalar_lea.hbm %s3763_s18, 128  ;;  %s2700_s19 = scalar_lea.hbm %s3948_s17, 256 }
 0xa6b   : > { %p2697_p5 = scmp.ne.s32.totalorder %s3763_s18, %s2696_s2  ;;  %p2701_p9 = scmp.lt.u32.totalorder %s3763_s18, %s3948_s17 }
 0xa6c   : > { %p2702_p10 = scmp.lt.u32.totalorder %s2700_s19, %s2696_s2  ;;  %p2704_p13 = scmp.lt.u32.totalorder %s2696_s2, %s3763_s18 }
 0xa6d   : > { %p2698_p6 = pnand %p2697_p5, %p2944_p7 }
 0xa6e   : > { %p2703_p11 = por %p2702_p10, %p2701_p9 }
 0xa6f   : > { %p2699_p8 = pneg %p2698_p6 }
 0xa70   : > { %p2705_p0 = por %p2704_p13, %p2703_p11 }
 0xa72   : > { %p2706_p1 = pnand %p2705_p0, %p2699_p8 }
 0xa74   : > { %2709 = shalt.err (!%p2706_p1)
}
 0xa75   : > { %2415 = dma.vmem_to_hbm [thread:$0]  (%p2944_p7), %s2036_s25, 128, %s3763_s18, %s2022_s22  }
 0xa76 PF: > { %s3951_s3 = sld [smem:[#allocation14_spill]]  ;;  %p2421_p2 = scmp.ge.s32.totalorder %s2792_s14, 2 }
 0xa78   : > { %p2418_p3 = pnand %p2421_p2, %p2952_p12 }
 0xa7c   : > { %s2047_s28 = sand.u32 1, %s3951_s3  }
 0xa7d   : > { %s2048_s24 = scalar_lea.sflag [#allocation12], %s2047_s28 }
 0xa7e   : > { %2751 = dma.done.wait (!%p2418_p3), %s2048_s24, 128  }
 0xa7f   : > { %2753 = vsyncadd (!%p2418_p3), %s2048_s24, 4294967168  ;;  %s28_s14 = sadd.s32 1, %s2792_s14   ;;  %s3953_s23 = sld [smem:[#allocation15_spill]] }
 0xa80   : > { %p25_p4 = scmp.ge.s32.totalorder %s28_s14, 6   ;;  %s3954_s18 = sld [smem:[#allocation16_spill]] }
 0xa81   : > { %s3955_s25 = smov %s2760_s26  ;;  %s3956_s26 = smov %s2764_s27 }
 0xa82   : > { %s3957_s27 = smov %s2957_s10  ;;  %s3958_s28 = smov %s2772_s29 }
 0xa83   : > { %s3959_s29 = smov %s2960_s15  ;;  %s3960_s30 = smov %s2784_s13 }
 0xa84   : > { %s3961_s2 = smov %s2788_s11  ;;  %27 = sbr.rel (!%p25_p4) target bundleno = 13 (0xd), region = 163 }
 0xa85   : > { %s3962_s13 = smov %s3953_s23 }
 0xa86   : > { %s3963_s11 = smov %s3954_s18 }
 0xa8b   :  { %2053 = vsyncpa [#allocation12], 1 }
 0xa8c   :  { %2055 = vsyncpa [#allocation12 + $0x1], 1 }

</bundles_post_ra>
